<compile_context>
chip_gen: v5e
topology: v5e:2x2
jax: 0.10.0
libtpu: 0.0.40
codegen_flags: <defaults>
</compile_context>

<pallas_src>
import jax
import jax.numpy as jnp
from jax.experimental import pallas as pl
from jax.experimental.pallas import tpu as pltpu

# ----------------------- small, ViT-consistent config -----------------------
IMG = 32            # image spatial size (small stand-in for 224)
PATCH = 16          # patch size (matches vit-base-patch16)
IN_CH = 3           # RGB
HIDDEN = 32         # hidden size (small stand-in for 768)
HEADS = 4           # attention heads (small stand-in for 12)
HEAD_DIM = HIDDEN // HEADS
LAYERS = 2          # encoder layers (small stand-in for 12)
INTERMEDIATE = 64   # MLP intermediate (small stand-in for 3072)
VOCAB = 16          # vocab_size for the OCR classifier
BATCH = 2
NUM_PATCHES = (IMG // PATCH) ** 2
SEQ = NUM_PATCHES + 1           # +1 CLS token (= 5)
SEQ_PAD = 8                     # sublane-aligned sequence length
PATCH_DIM = IN_CH * PATCH * PATCH
LN_EPS = 1e-12                  # ViT layer_norm_eps
VOCAB_PAD = 128                 # lane-dense classifier output (sliced back)
ATTN_SCALE = HEAD_DIM ** -0.5
NEG_INF = -1e30                 # additive mask for padded key positions


# ------------------------------ fused kernel --------------------------------
def _vit_forward_kernel(
    # inputs (21)
    patches_ref, patch_w_ref, patch_b_ref, cls_ref, pos_ref,
    ln1_g_ref, ln1_b_ref, qkv_w_ref, qkv_b_ref, out_w_ref, out_b_ref,
    ln2_g_ref, ln2_b_ref, fc1_w_ref, fc1_b_ref, fc2_w_ref, fc2_b_ref,
    fln_g_ref, fln_b_ref, head_w_ref, head_b_ref,
    # output
    logits_ref,
    # VMEM scratch
    h_ref, qkv_ref,
):
    f32 = jnp.float32

    def layer_norm(x, g, b):
        mu = jnp.mean(x, axis=-1, keepdims=True)
        xc = x - mu
        var = jnp.mean(xc * xc, axis=-1, keepdims=True)
        return xc * jax.lax.rsqrt(var + LN_EPS) * g + b

    def gelu_exact(x):
        # erf-based GELU, same as torch.nn.GELU() used by HF ViT ("gelu").
        return 0.5 * x * (1.0 + jax.lax.erf(x * 0.7071067811865476))

    # Additive softmax mask: key positions >= SEQ (sublane padding) get -1e30,
    # so the padded rows never influence the real 5 tokens.
    key_ids = jax.lax.broadcasted_iota(jnp.int32, (1, SEQ_PAD), 1)
    key_mask = jnp.where(key_ids < SEQ, 0.0, NEG_INF).astype(f32)

    # ---- patch embedding + [CLS] + position embeddings (stays in VMEM) ----
    emb = jnp.dot(patches_ref[0], patch_w_ref[...],
                  preferred_element_type=f32) + patch_b_ref[...]
    h_ref[0:1, :] = cls_ref[...] + pos_ref[0:1, :]
    h_ref[1:SEQ, :] = emb + pos_ref[1:SEQ, :]
    h_ref[SEQ:, :] = jnp.zeros((SEQ_PAD - SEQ, HIDDEN), f32)   # padded rows
    h = h_ref[...]                                             # (SEQ_PAD, HIDDEN)

    # ---- transformer encoder, fully fused; h never leaves VMEM ----
    for l in range(LAYERS):
        # pre-LN + fused QKV projection (1/sqrt(Dh) folded into Q weights)
        xa = layer_norm(h, ln1_g_ref[l], ln1_b_ref[l])
        qkv_ref[...] = jnp.dot(xa, qkv_w_ref[l],
                               preferred_element_type=f32) + qkv_b_ref[l]

        out_w = out_w_ref[l]                               # (HIDDEN, HIDDEN)
        attn = jnp.zeros((SEQ_PAD, HIDDEN), f32)
        for hh in range(HEADS):
            o = hh * HEAD_DIM
            qh = qkv_ref[:, o:o + HEAD_DIM]                            # (S, Dh)
            kh = qkv_ref[:, HIDDEN + o:HIDDEN + o + HEAD_DIM]          # (S, Dh)
            vh = qkv_ref[:, 2 * HIDDEN + o:2 * HIDDEN + o + HEAD_DIM]  # (S, Dh)
            # scores = q_scaled @ k^T  (contract on head_dim)
            s = jax.lax.dot_general(qh, kh, (((1,), (1,)), ((), ())),
                                    preferred_element_type=f32)
            s = s + key_mask                       # mask padded key positions
            s = s - jnp.max(s, axis=-1, keepdims=True)
            p = jnp.exp(s)
            p = p * pl.reciprocal(jnp.sum(p, axis=-1, keepdims=True),
                                  approx=True)
            ctx = jnp.dot(p, vh, preferred_element_type=f32)           # (S, Dh)
            # merge-heads + output projection fused: accumulate per-head
            # contribution against the matching sublane slice of out_w.
            attn = attn + jnp.dot(ctx, out_w[o:o + HEAD_DIM, :],
                                  preferred_element_type=f32)
        h = h + attn + out_b_ref[l]                        # residual + bias

        # pre-LN + MLP (GELU) + residual
        xm = layer_norm(h, ln2_g_ref[l], ln2_b_ref[l])
        m = gelu_exact(jnp.dot(xm, fc1_w_ref[l],
                               preferred_element_type=f32) + fc1_b_ref[l])
        m = jnp.dot(m, fc2_w_ref[l], preferred_element_type=f32) + fc2_b_ref[l]
        h = h + m

    # ---- final LayerNorm -> token classifier (lane-padded to 128) ----
    hf = layer_norm(h, fln_g_ref[...], fln_b_ref[...])
    logits_ref[0] = (jnp.dot(hf, head_w_ref[...], preferred_element_type=f32)
                     + head_b_ref[...]).astype(logits_ref.dtype)


# ------------------------- parameter initialization --------------------------
def init_params(key):
    keys = list(jax.random.split(key, 8 + LAYERS * 12))
    kit = iter(keys)

    def nrm(shape, scale=0.02):
        return (scale * jax.random.normal(next(kit), shape)).astype(jnp.float32)

    def zeros(shape):
        return jnp.zeros(shape, jnp.float32)

    def ones(shape):
        return jnp.ones(shape, jnp.float32)

    params = {
        # patch-embedding conv (kernel=stride=16) expressed as a matmul weight
        "patch_w": nrm((PATCH_DIM, HIDDEN)),
        "patch_b": zeros((HIDDEN,)),
        "cls": nrm((1, 1, HIDDEN)),
        "pos": nrm((1, SEQ, HIDDEN)),
        "final_ln_g": ones((HIDDEN,)),
        "final_ln_b": zeros((HIDDEN,)),
        "cls_w": nrm((HIDDEN, VOCAB)),
        "cls_b": zeros((VOCAB,)),
        "layers": [],
    }
    for _ in range(LAYERS):
        params["layers"].append(dict(
            ln1_g=ones((HIDDEN,)), ln1_b=zeros((HIDDEN,)),
            q_w=nrm((HIDDEN, HIDDEN)), q_b=zeros((HIDDEN,)),
            k_w=nrm((HIDDEN, HIDDEN)), k_b=zeros((HIDDEN,)),
            v_w=nrm((HIDDEN, HIDDEN)), v_b=zeros((HIDDEN,)),
            out_w=nrm((HIDDEN, HIDDEN)), out_b=zeros((HIDDEN,)),
            ln2_g=ones((HIDDEN,)), ln2_b=zeros((HIDDEN,)),
            fc1_w=nrm((HIDDEN, INTERMEDIATE)), fc1_b=zeros((INTERMEDIATE,)),
            fc2_w=nrm((INTERMEDIATE, HIDDEN)), fc2_b=zeros((HIDDEN,)),
        ))
    return params


# --------------------------------- forward -----------------------------------
def vit_for_bengali_ocr(pixel_values, params):
    """pixel_values: (B, C, H, W) float32 (NCHW, like PyTorch)."""
    B = pixel_values.shape[0]

    # Patch embedding im2col: Conv2d(C, HIDDEN, k=16, s=16) == patch extract +
    # matmul.  Pure data movement on a ~12 KB tensor, kept in XLA glue.
    # TODO(synk): fold the NCHW->patch rearrangement into the kernel prologue.
    x = pixel_values.reshape(B, IN_CH, IMG // PATCH, PATCH, IMG // PATCH, PATCH)
    x = x.transpose(0, 2, 4, 1, 3, 5)                 # (B, nh, nw, C, p, p)
    patches = x.reshape(B, NUM_PATCHES, PATCH_DIM)    # (B, 4, 768)

    # ---- pack weights: stack layers, fuse QKV (scale folded into Q), pad head
    lps = params["layers"]

    def stack_bias(name, n):                          # -> (L, 1, n)
        return jnp.stack([lp[name].reshape(1, n) for lp in lps])

    qkv_w = jnp.stack([jnp.concatenate(
        [lp["q_w"] * ATTN_SCALE, lp["k_w"], lp["v_w"]], axis=1) for lp in lps])
    qkv_b = jnp.stack([jnp.concatenate(
        [lp["q_b"] * ATTN_SCALE, lp["k_b"], lp["v_b"]]).reshape(1, 3 * HIDDEN)
        for lp in lps])
    out_w = jnp.stack([lp["out_w"] for lp in lps])
    fc1_w = jnp.stack([lp["fc1_w"] for lp in lps])
    fc2_w = jnp.stack([lp["fc2_w"] for lp in lps])

    head_w = jnp.zeros((HIDDEN, VOCAB_PAD), jnp.float32).at[:, :VOCAB].set(
        params["cls_w"])
    head_b = jnp.zeros((1, VOCAB_PAD), jnp.float32).at[:, :VOCAB].set(
        params["cls_b"])

    args = (
        patches,
        params["patch_w"], params["patch_b"].reshape(1, HIDDEN),
        params["cls"].reshape(1, HIDDEN), params["pos"].reshape(SEQ, HIDDEN),
        stack_bias("ln1_g", HIDDEN), stack_bias("ln1_b", HIDDEN),
        qkv_w, qkv_b, out_w, stack_bias("out_b", HIDDEN),
        stack_bias("ln2_g", HIDDEN), stack_bias("ln2_b", HIDDEN),
        fc1_w, stack_bias("fc1_b", INTERMEDIATE),
        fc2_w, stack_bias("fc2_b", HIDDEN),
        params["final_ln_g"].reshape(1, HIDDEN),
        params["final_ln_b"].reshape(1, HIDDEN),
        head_w, head_b,
    )

    rep2 = lambda b: (0, 0)
    rep3 = lambda b: (0, 0, 0)
    in_specs = [pl.BlockSpec((1, NUM_PATCHES, PATCH_DIM), lambda b: (b, 0, 0))]
    for a in args[1:]:   # weights: full-array blocks, same block every step
        in_specs.append(pl.BlockSpec(a.shape, rep3 if a.ndim == 3 else rep2))

    logits_pad = pl.pallas_call(
        _vit_forward_kernel,
        out_shape=jax.ShapeDtypeStruct((B, SEQ_PAD, VOCAB_PAD), jnp.float32),
        grid=(B,),
        in_specs=in_specs,
        out_specs=pl.BlockSpec((1, SEQ_PAD, VOCAB_PAD), lambda b: (b, 0, 0)),
        scratch_shapes=[
            pltpu.VMEM((SEQ_PAD, HIDDEN), jnp.float32),       # resident h
            pltpu.VMEM((SEQ_PAD, 3 * HIDDEN), jnp.float32),   # fused QKV stage
        ],
        compiler_params=pltpu.CompilerParams(
            dimension_semantics=("parallel",)),  # shards batch over 2 TCs (v7x)
    )(*args)

    # drop sublane padding rows and lane padding columns
    return logits_pad[:, :SEQ, :VOCAB]


# ----------------------------------- main -------------------------------------
if __name__ == "__main__":
    key = jax.random.PRNGKey(0)
    k_img, k_params = jax.random.split(key)
    pixel_values = jax.random.normal(
        k_img, (BATCH, IN_CH, IMG, IMG), dtype=jnp.float32)
    params = init_params(k_params)

    logits = jax.jit(vit_for_bengali_ocr)(pixel_values, params)
    logits = jax.block_until_ready(logits)

    assert logits.shape == (BATCH, SEQ, VOCAB), logits.shape
    assert jnp.all(jnp.isfinite(logits))
    # TODO(synk): pretrained 'google/vit-base-patch16-224' weights are replaced
    # by deterministic synthetic initialization (no checkpoint loading).
    print("KERNEL_OK")
</pallas_src>

<mosaic_0001>
module attributes {stable_mosaic.version = 11 : i64} {
  func.func @_vit_forward_kernel(%arg0: i32, %arg1: memref<1x4x768xf32, #tpu.memory_space<vmem>>, %arg2: memref<768x32xf32, #tpu.memory_space<vmem>>, %arg3: memref<1x32xf32, #tpu.memory_space<vmem>>, %arg4: memref<1x32xf32, #tpu.memory_space<vmem>>, %arg5: memref<5x32xf32, #tpu.memory_space<vmem>>, %arg6: memref<2x1x32xf32, #tpu.memory_space<vmem>>, %arg7: memref<2x1x32xf32, #tpu.memory_space<vmem>>, %arg8: memref<2x32x96xf32, #tpu.memory_space<vmem>>, %arg9: memref<2x1x96xf32, #tpu.memory_space<vmem>>, %arg10: memref<2x32x32xf32, #tpu.memory_space<vmem>>, %arg11: memref<2x1x32xf32, #tpu.memory_space<vmem>>, %arg12: memref<2x1x32xf32, #tpu.memory_space<vmem>>, %arg13: memref<2x1x32xf32, #tpu.memory_space<vmem>>, %arg14: memref<2x32x64xf32, #tpu.memory_space<vmem>>, %arg15: memref<2x1x64xf32, #tpu.memory_space<vmem>>, %arg16: memref<2x64x32xf32, #tpu.memory_space<vmem>>, %arg17: memref<2x1x32xf32, #tpu.memory_space<vmem>>, %arg18: memref<1x32xf32, #tpu.memory_space<vmem>>, %arg19: memref<1x32xf32, #tpu.memory_space<vmem>>, %arg20: memref<32x128xf32, #tpu.memory_space<vmem>>, %arg21: memref<1x128xf32, #tpu.memory_space<vmem>>, %arg22: memref<1x8x128xf32, #tpu.memory_space<vmem>>, %arg23: memref<8x32xf32, #tpu.memory_space<vmem>>, %arg24: memref<8x96xf32, #tpu.memory_space<vmem>>) attributes {dimension_semantics = [#tpu.dimension_semantics<parallel>], iteration_bounds = array<i64: 2>, scalar_prefetch = 0 : i64, scratch_operands = 2 : i64, tpu.core_type = #tpu.core_type<tc>, window_params = [{transform_indices = @transform_0, window_bounds = array<i64: 1, 4, 768>}, {pipeline_mode = #tpu.pipeline_mode<synchronous>, transform_indices = @transform_1, window_bounds = array<i64: 768, 32>}, {pipeline_mode = #tpu.pipeline_mode<synchronous>, transform_indices = @transform_2, window_bounds = array<i64: 1, 32>}, {pipeline_mode = #tpu.pipeline_mode<synchronous>, transform_indices = @transform_3, window_bounds = array<i64: 1, 32>}, {pipeline_mode = #tpu.pipeline_mode<synchronous>, transform_indices = @transform_4, window_bounds = array<i64: 5, 32>}, {pipeline_mode = #tpu.pipeline_mode<synchronous>, transform_indices = @transform_5, window_bounds = array<i64: 2, 1, 32>}, {pipeline_mode = #tpu.pipeline_mode<synchronous>, transform_indices = @transform_6, window_bounds = array<i64: 2, 1, 32>}, {pipeline_mode = #tpu.pipeline_mode<synchronous>, transform_indices = @transform_7, window_bounds = array<i64: 2, 32, 96>}, {pipeline_mode = #tpu.pipeline_mode<synchronous>, transform_indices = @transform_8, window_bounds = array<i64: 2, 1, 96>}, {pipeline_mode = #tpu.pipeline_mode<synchronous>, transform_indices = @transform_9, window_bounds = array<i64: 2, 32, 32>}, {pipeline_mode = #tpu.pipeline_mode<synchronous>, transform_indices = @transform_10, window_bounds = array<i64: 2, 1, 32>}, {pipeline_mode = #tpu.pipeline_mode<synchronous>, transform_indices = @transform_11, window_bounds = array<i64: 2, 1, 32>}, {pipeline_mode = #tpu.pipeline_mode<synchronous>, transform_indices = @transform_12, window_bounds = array<i64: 2, 1, 32>}, {pipeline_mode = #tpu.pipeline_mode<synchronous>, transform_indices = @transform_13, window_bounds = array<i64: 2, 32, 64>}, {pipeline_mode = #tpu.pipeline_mode<synchronous>, transform_indices = @transform_14, window_bounds = array<i64: 2, 1, 64>}, {pipeline_mode = #tpu.pipeline_mode<synchronous>, transform_indices = @transform_15, window_bounds = array<i64: 2, 64, 32>}, {pipeline_mode = #tpu.pipeline_mode<synchronous>, transform_indices = @transform_16, window_bounds = array<i64: 2, 1, 32>}, {pipeline_mode = #tpu.pipeline_mode<synchronous>, transform_indices = @transform_17, window_bounds = array<i64: 1, 32>}, {pipeline_mode = #tpu.pipeline_mode<synchronous>, transform_indices = @transform_18, window_bounds = array<i64: 1, 32>}, {pipeline_mode = #tpu.pipeline_mode<synchronous>, transform_indices = @transform_19, window_bounds = array<i64: 32, 128>}, {pipeline_mode = #tpu.pipeline_mode<synchronous>, transform_indices = @transform_20, window_bounds = array<i64: 1, 128>}, {transform_indices = @transform_21, window_bounds = array<i64: 1, 8, 128>}]} {
    %0 = tpu.iota {dimensions = array<i32: 1>} : vector<1x8xi32>
    %c5_i32 = arith.constant 5 : i32
    %1 = vector.broadcast %c5_i32 : i32 to vector<1x8xi32>
    %2 = arith.cmpi slt, %0, %1 : vector<1x8xi32>
    %cst = arith.constant 0.000000e+00 : f32
    %cst_0 = arith.constant -1.000000e+30 : f32
    %3 = vector.broadcast %cst : f32 to vector<1x8xf32>
    %4 = vector.broadcast %cst_0 : f32 to vector<1x8xf32>
    %5 = arith.select %2, %3, %4 : vector<1x8xi1>, vector<1x8xf32>
    %c0 = arith.constant 0 : index
    %c0_1 = arith.constant 0 : index
    %c0_2 = arith.constant 0 : index
    %6 = vector.load %arg1[%c0, %c0_1, %c0_2] : memref<1x4x768xf32, #tpu.memory_space<vmem>>, vector<1x4x768xf32>
    %7 = vector.shape_cast %6 : vector<1x4x768xf32> to vector<4x768xf32>
    %c0_3 = arith.constant 0 : index
    %c0_4 = arith.constant 0 : index
    %8 = vector.load %arg2[%c0_3, %c0_4] : memref<768x32xf32, #tpu.memory_space<vmem>>, vector<768x32xf32>
    %cst_5 = arith.constant dense<0.000000e+00> : vector<4x32xf32>
    %9 = tpu.matmul %7, %8, %cst_5 {dimension_numbers = #tpu.dot_dimension_numbers<[1], [0], [0], [1], [0, 0, 1, 1], [], []>} : vector<4x768xf32>, vector<768x32xf32>, vector<4x32xf32> -> vector<4x32xf32>
    %c0_6 = arith.constant 0 : index
    %c0_7 = arith.constant 0 : index
    %10 = vector.load %arg3[%c0_6, %c0_7] : memref<1x32xf32, #tpu.memory_space<vmem>>, vector<1x32xf32>
    %11 = vector.broadcast %10 : vector<1x32xf32> to vector<4x32xf32>
    %12 = arith.addf %9, %11 : vector<4x32xf32>
    %c0_8 = arith.constant 0 : index
    %c0_9 = arith.constant 0 : index
    %13 = vector.load %arg4[%c0_8, %c0_9] : memref<1x32xf32, #tpu.memory_space<vmem>>, vector<1x32xf32>
    %c0_10 = arith.constant 0 : index
    %c0_11 = arith.constant 0 : index
    %14 = vector.load %arg5[%c0_10, %c0_11] : memref<5x32xf32, #tpu.memory_space<vmem>>, vector<1x32xf32>
    %15 = arith.addf %13, %14 : vector<1x32xf32>
    %c0_12 = arith.constant 0 : index
    %c0_13 = arith.constant 0 : index
    %16 = vector.load %arg23[%c0_12, %c0_13] : memref<8x32xf32, #tpu.memory_space<vmem>>, vector<1x32xf32>
    tpu.vector_store %arg23[%c0_12, %c0_13], %15 {strides = array<i32>} : memref<8x32xf32, #tpu.memory_space<vmem>>, vector<1x32xf32>,
    %c1 = arith.constant 1 : index
    %c0_14 = arith.constant 0 : index
    %17 = vector.load %arg5[%c1, %c0_14] : memref<5x32xf32, #tpu.memory_space<vmem>>, vector<4x32xf32>
    %18 = arith.addf %12, %17 : vector<4x32xf32>
    %c1_15 = arith.constant 1 : index
    %c0_16 = arith.constant 0 : index
    %19 = vector.load %arg23[%c1_15, %c0_16] : memref<8x32xf32, #tpu.memory_space<vmem>>, vector<4x32xf32>
    tpu.vector_store %arg23[%c1_15, %c0_16], %18 {strides = array<i32>} : memref<8x32xf32, #tpu.memory_space<vmem>>, vector<4x32xf32>,
    %cst_17 = arith.constant 0.000000e+00 : f32
    %20 = vector.broadcast %cst_17 : f32 to vector<3x32xf32>
    %c5 = arith.constant 5 : index
    %c0_18 = arith.constant 0 : index
    %21 = vector.load %arg23[%c5, %c0_18] : memref<8x32xf32, #tpu.memory_space<vmem>>, vector<3x32xf32>
    tpu.vector_store %arg23[%c5, %c0_18], %20 {strides = array<i32>} : memref<8x32xf32, #tpu.memory_space<vmem>>, vector<3x32xf32>,
    %c0_19 = arith.constant 0 : index
    %c0_20 = arith.constant 0 : index
    %22 = vector.load %arg23[%c0_19, %c0_20] : memref<8x32xf32, #tpu.memory_space<vmem>>, vector<8x32xf32>
    %c0_21 = arith.constant 0 : index
    %c0_22 = arith.constant 0 : index
    %c0_23 = arith.constant 0 : index
    %23 = vector.load %arg6[%c0_21, %c0_22, %c0_23] : memref<2x1x32xf32, #tpu.memory_space<vmem>>, vector<1x1x32xf32>
    %24 = vector.shape_cast %23 : vector<1x1x32xf32> to vector<1x32xf32>
    %c0_24 = arith.constant 0 : index
    %c0_25 = arith.constant 0 : index
    %c0_26 = arith.constant 0 : index
    %25 = vector.load %arg7[%c0_24, %c0_25, %c0_26] : memref<2x1x32xf32, #tpu.memory_space<vmem>>, vector<1x1x32xf32>
    %26 = vector.shape_cast %25 : vector<1x1x32xf32> to vector<1x32xf32>
    %cst_27 = arith.constant dense<0.000000e+00> : vector<8xf32>
    %27 = vector.multi_reduction <add>, %22, %cst_27 [1] : vector<8x32xf32> to vector<8xf32>
    %28 = vector.shape_cast %27 : vector<8xf32> to vector<8x1xf32>
    %cst_28 = arith.constant 3.200000e+01 : f32
    %29 = vector.broadcast %cst_28 : f32 to vector<8x1xf32>
    %30 = arith.divf %28, %29 : vector<8x1xf32>
    %31 = vector.broadcast %30 : vector<8x1xf32> to vector<8x32xf32>
    %32 = arith.subf %22, %31 : vector<8x32xf32>
    %33 = arith.mulf %32, %32 : vector<8x32xf32>
    %cst_29 = arith.constant dense<0.000000e+00> : vector<8xf32>
    %34 = vector.multi_reduction <add>, %33, %cst_29 [1] : vector<8x32xf32> to vector<8xf32>
    %35 = vector.shape_cast %34 : vector<8xf32> to vector<8x1xf32>
    %cst_30 = arith.constant 3.200000e+01 : f32
    %36 = vector.broadcast %cst_30 : f32 to vector<8x1xf32>
    %37 = arith.divf %35, %36 : vector<8x1xf32>
    %cst_31 = arith.constant 9.99999996E-13 : f32
    %38 = vector.broadcast %cst_31 : f32 to vector<8x1xf32>
    %39 = arith.addf %37, %38 : vector<8x1xf32>
    %40 = math.rsqrt %39 : vector<8x1xf32>
    %41 = vector.broadcast %40 : vector<8x1xf32> to vector<8x32xf32>
    %42 = arith.mulf %32, %41 : vector<8x32xf32>
    %43 = vector.broadcast %24 : vector<1x32xf32> to vector<8x32xf32>
    %44 = arith.mulf %42, %43 : vector<8x32xf32>
    %45 = vector.broadcast %26 : vector<1x32xf32> to vector<8x32xf32>
    %46 = arith.addf %44, %45 : vector<8x32xf32>
    %c0_32 = arith.constant 0 : index
    %c0_33 = arith.constant 0 : index
    %c0_34 = arith.constant 0 : index
    %47 = vector.load %arg8[%c0_32, %c0_33, %c0_34] : memref<2x32x96xf32, #tpu.memory_space<vmem>>, vector<1x32x96xf32>
    %48 = vector.shape_cast %47 : vector<1x32x96xf32> to vector<32x96xf32>
    %cst_35 = arith.constant dense<0.000000e+00> : vector<8x96xf32>
    %49 = tpu.matmul %46, %48, %cst_35 {dimension_numbers = #tpu.dot_dimension_numbers<[1], [0], [0], [1], [0, 0, 1, 1], [], []>} : vector<8x32xf32>, vector<32x96xf32>, vector<8x96xf32> -> vector<8x96xf32>
    %c0_36 = arith.constant 0 : index
    %c0_37 = arith.constant 0 : index
    %c0_38 = arith.constant 0 : index
    %50 = vector.load %arg9[%c0_36, %c0_37, %c0_38] : memref<2x1x96xf32, #tpu.memory_space<vmem>>, vector<1x1x96xf32>
    %51 = vector.shape_cast %50 : vector<1x1x96xf32> to vector<1x96xf32>
    %52 = vector.broadcast %51 : vector<1x96xf32> to vector<8x96xf32>
    %53 = arith.addf %49, %52 : vector<8x96xf32>
    %c0_39 = arith.constant 0 : index
    %c0_40 = arith.constant 0 : index
    %54 = vector.load %arg24[%c0_39, %c0_40] : memref<8x96xf32, #tpu.memory_space<vmem>>, vector<8x96xf32>
    tpu.vector_store %arg24[%c0_39, %c0_40], %53 {strides = array<i32>} : memref<8x96xf32, #tpu.memory_space<vmem>>, vector<8x96xf32>,
    %c0_41 = arith.constant 0 : index
    %c0_42 = arith.constant 0 : index
    %c0_43 = arith.constant 0 : index
    %55 = vector.load %arg10[%c0_41, %c0_42, %c0_43] : memref<2x32x32xf32, #tpu.memory_space<vmem>>, vector<1x32x32xf32>
    %56 = vector.shape_cast %55 : vector<1x32x32xf32> to vector<32x32xf32>
    %cst_44 = arith.constant 0.000000e+00 : f32
    %57 = vector.broadcast %cst_44 : f32 to vector<8x32xf32>
    %c0_45 = arith.constant 0 : index
    %c0_46 = arith.constant 0 : index
    %58 = vector.load %arg24[%c0_45, %c0_46] : memref<8x96xf32, #tpu.memory_space<vmem>>, vector<8x8xf32>
    %c0_47 = arith.constant 0 : index
    %c32 = arith.constant 32 : index
    %59 = vector.load %arg24[%c0_47, %c32] : memref<8x96xf32, #tpu.memory_space<vmem>>, vector<8x8xf32>
    %c0_48 = arith.constant 0 : index
    %c64 = arith.constant 64 : index
    %60 = vector.load %arg24[%c0_48, %c64] : memref<8x96xf32, #tpu.memory_space<vmem>>, vector<8x8xf32>
    %cst_49 = arith.constant dense<0.000000e+00> : vector<8x8xf32>
    %61 = tpu.matmul %58, %59, %cst_49 {dimension_numbers = #tpu.dot_dimension_numbers<[1], [1], [0], [0], [0, 0, 1, 0], [], []>} : vector<8x8xf32>, vector<8x8xf32>, vector<8x8xf32> -> vector<8x8xf32>
    %62 = vector.broadcast %5 : vector<1x8xf32> to vector<8x8xf32>
    %63 = arith.addf %61, %62 : vector<8x8xf32>
    %cst_50 = arith.constant dense<0xFF800000> : vector<8xf32>
    %64 = vector.multi_reduction <maximumf>, %63, %cst_50 [1] : vector<8x8xf32> to vector<8xf32>
    %65 = vector.shape_cast %64 : vector<8xf32> to vector<8x1xf32>
    %66 = vector.broadcast %65 : vector<8x1xf32> to vector<8x8xf32>
    %67 = arith.subf %63, %66 : vector<8x8xf32>
    %68 = math.exp %67 : vector<8x8xf32>
    %cst_51 = arith.constant dense<0.000000e+00> : vector<8xf32>
    %69 = vector.multi_reduction <add>, %68, %cst_51 [1] : vector<8x8xf32> to vector<8xf32>
    %70 = vector.shape_cast %69 : vector<8xf32> to vector<8x1xf32>
    %71 = tpu.reciprocal %70 {approx = true} : vector<8x1xf32> -> vector<8x1xf32>
    %72 = vector.broadcast %71 : vector<8x1xf32> to vector<8x8xf32>
    %73 = arith.mulf %68, %72 : vector<8x8xf32>
    %cst_52 = arith.constant dense<0.000000e+00> : vector<8x8xf32>
    %74 = tpu.matmul %73, %60, %cst_52 {dimension_numbers = #tpu.dot_dimension_numbers<[1], [0], [0], [1], [0, 0, 1, 1], [], []>} : vector<8x8xf32>, vector<8x8xf32>, vector<8x8xf32> -> vector<8x8xf32>
    %75 = vector.extract_strided_slice %56 {offsets = [0, 0], sizes = [8, 32], strides = [1, 1]} : vector<32x32xf32> to vector<8x32xf32>
    %cst_53 = arith.constant dense<0.000000e+00> : vector<8x32xf32>
    %76 = tpu.matmul %74, %75, %cst_53 {dimension_numbers = #tpu.dot_dimension_numbers<[1], [0], [0], [1], [0, 0, 1, 1], [], []>} : vector<8x8xf32>, vector<8x32xf32>, vector<8x32xf32> -> vector<8x32xf32>
    %77 = arith.addf %57, %76 : vector<8x32xf32>
    %c0_54 = arith.constant 0 : index
    %c8 = arith.constant 8 : index
    %78 = vector.load %arg24[%c0_54, %c8] : memref<8x96xf32, #tpu.memory_space<vmem>>, vector<8x8xf32>
    %c0_55 = arith.constant 0 : index
    %c40 = arith.constant 40 : index
    %79 = vector.load %arg24[%c0_55, %c40] : memref<8x96xf32, #tpu.memory_space<vmem>>, vector<8x8xf32>
    %c0_56 = arith.constant 0 : index
    %c72 = arith.constant 72 : index
    %80 = vector.load %arg24[%c0_56, %c72] : memref<8x96xf32, #tpu.memory_space<vmem>>, vector<8x8xf32>
    %cst_57 = arith.constant dense<0.000000e+00> : vector<8x8xf32>
    %81 = tpu.matmul %78, %79, %cst_57 {dimension_numbers = #tpu.dot_dimension_numbers<[1], [1], [0], [0], [0, 0, 1, 0], [], []>} : vector<8x8xf32>, vector<8x8xf32>, vector<8x8xf32> -> vector<8x8xf32>
    %82 = vector.broadcast %5 : vector<1x8xf32> to vector<8x8xf32>
    %83 = arith.addf %81, %82 : vector<8x8xf32>
    %cst_58 = arith.constant dense<0xFF800000> : vector<8xf32>
    %84 = vector.multi_reduction <maximumf>, %83, %cst_58 [1] : vector<8x8xf32> to vector<8xf32>
    %85 = vector.shape_cast %84 : vector<8xf32> to vector<8x1xf32>
    %86 = vector.broadcast %85 : vector<8x1xf32> to vector<8x8xf32>
    %87 = arith.subf %83, %86 : vector<8x8xf32>
    %88 = math.exp %87 : vector<8x8xf32>
    %cst_59 = arith.constant dense<0.000000e+00> : vector<8xf32>
    %89 = vector.multi_reduction <add>, %88, %cst_59 [1] : vector<8x8xf32> to vector<8xf32>
    %90 = vector.shape_cast %89 : vector<8xf32> to vector<8x1xf32>
    %91 = tpu.reciprocal %90 {approx = true} : vector<8x1xf32> -> vector<8x1xf32>
    %92 = vector.broadcast %91 : vector<8x1xf32> to vector<8x8xf32>
    %93 = arith.mulf %88, %92 : vector<8x8xf32>
    %cst_60 = arith.constant dense<0.000000e+00> : vector<8x8xf32>
    %94 = tpu.matmul %93, %80, %cst_60 {dimension_numbers = #tpu.dot_dimension_numbers<[1], [0], [0], [1], [0, 0, 1, 1], [], []>} : vector<8x8xf32>, vector<8x8xf32>, vector<8x8xf32> -> vector<8x8xf32>
    %95 = vector.extract_strided_slice %56 {offsets = [8, 0], sizes = [8, 32], strides = [1, 1]} : vector<32x32xf32> to vector<8x32xf32>
    %cst_61 = arith.constant dense<0.000000e+00> : vector<8x32xf32>
    %96 = tpu.matmul %94, %95, %cst_61 {dimension_numbers = #tpu.dot_dimension_numbers<[1], [0], [0], [1], [0, 0, 1, 1], [], []>} : vector<8x8xf32>, vector<8x32xf32>, vector<8x32xf32> -> vector<8x32xf32>
    %97 = arith.addf %77, %96 : vector<8x32xf32>
    %c0_62 = arith.constant 0 : index
    %c16 = arith.constant 16 : index
    %98 = vector.load %arg24[%c0_62, %c16] : memref<8x96xf32, #tpu.memory_space<vmem>>, vector<8x8xf32>
    %c0_63 = arith.constant 0 : index
    %c48 = arith.constant 48 : index
    %99 = vector.load %arg24[%c0_63, %c48] : memref<8x96xf32, #tpu.memory_space<vmem>>, vector<8x8xf32>
    %c0_64 = arith.constant 0 : index
    %c80 = arith.constant 80 : index
    %100 = vector.load %arg24[%c0_64, %c80] : memref<8x96xf32, #tpu.memory_space<vmem>>, vector<8x8xf32>
    %cst_65 = arith.constant dense<0.000000e+00> : vector<8x8xf32>
    %101 = tpu.matmul %98, %99, %cst_65 {dimension_numbers = #tpu.dot_dimension_numbers<[1], [1], [0], [0], [0, 0, 1, 0], [], []>} : vector<8x8xf32>, vector<8x8xf32>, vector<8x8xf32> -> vector<8x8xf32>
    %102 = vector.broadcast %5 : vector<1x8xf32> to vector<8x8xf32>
    %103 = arith.addf %101, %102 : vector<8x8xf32>
    %cst_66 = arith.constant dense<0xFF800000> : vector<8xf32>
    %104 = vector.multi_reduction <maximumf>, %103, %cst_66 [1] : vector<8x8xf32> to vector<8xf32>
    %105 = vector.shape_cast %104 : vector<8xf32> to vector<8x1xf32>
    %106 = vector.broadcast %105 : vector<8x1xf32> to vector<8x8xf32>
    %107 = arith.subf %103, %106 : vector<8x8xf32>
    %108 = math.exp %107 : vector<8x8xf32>
    %cst_67 = arith.constant dense<0.000000e+00> : vector<8xf32>
    %109 = vector.multi_reduction <add>, %108, %cst_67 [1] : vector<8x8xf32> to vector<8xf32>
    %110 = vector.shape_cast %109 : vector<8xf32> to vector<8x1xf32>
    %111 = tpu.reciprocal %110 {approx = true} : vector<8x1xf32> -> vector<8x1xf32>
    %112 = vector.broadcast %111 : vector<8x1xf32> to vector<8x8xf32>
    %113 = arith.mulf %108, %112 : vector<8x8xf32>
    %cst_68 = arith.constant dense<0.000000e+00> : vector<8x8xf32>
    %114 = tpu.matmul %113, %100, %cst_68 {dimension_numbers = #tpu.dot_dimension_numbers<[1], [0], [0], [1], [0, 0, 1, 1], [], []>} : vector<8x8xf32>, vector<8x8xf32>, vector<8x8xf32> -> vector<8x8xf32>
    %115 = vector.extract_strided_slice %56 {offsets = [16, 0], sizes = [8, 32], strides = [1, 1]} : vector<32x32xf32> to vector<8x32xf32>
    %cst_69 = arith.constant dense<0.000000e+00> : vector<8x32xf32>
    %116 = tpu.matmul %114, %115, %cst_69 {dimension_numbers = #tpu.dot_dimension_numbers<[1], [0], [0], [1], [0, 0, 1, 1], [], []>} : vector<8x8xf32>, vector<8x32xf32>, vector<8x32xf32> -> vector<8x32xf32>
    %117 = arith.addf %97, %116 : vector<8x32xf32>
    %c0_70 = arith.constant 0 : index
    %c24 = arith.constant 24 : index
    %118 = vector.load %arg24[%c0_70, %c24] : memref<8x96xf32, #tpu.memory_space<vmem>>, vector<8x8xf32>
    %c0_71 = arith.constant 0 : index
    %c56 = arith.constant 56 : index
    %119 = vector.load %arg24[%c0_71, %c56] : memref<8x96xf32, #tpu.memory_space<vmem>>, vector<8x8xf32>
    %c0_72 = arith.constant 0 : index
    %c88 = arith.constant 88 : index
    %120 = vector.load %arg24[%c0_72, %c88] : memref<8x96xf32, #tpu.memory_space<vmem>>, vector<8x8xf32>
    %cst_73 = arith.constant dense<0.000000e+00> : vector<8x8xf32>
    %121 = tpu.matmul %118, %119, %cst_73 {dimension_numbers = #tpu.dot_dimension_numbers<[1], [1], [0], [0], [0, 0, 1, 0], [], []>} : vector<8x8xf32>, vector<8x8xf32>, vector<8x8xf32> -> vector<8x8xf32>
    %122 = vector.broadcast %5 : vector<1x8xf32> to vector<8x8xf32>
    %123 = arith.addf %121, %122 : vector<8x8xf32>
    %cst_74 = arith.constant dense<0xFF800000> : vector<8xf32>
    %124 = vector.multi_reduction <maximumf>, %123, %cst_74 [1] : vector<8x8xf32> to vector<8xf32>
    %125 = vector.shape_cast %124 : vector<8xf32> to vector<8x1xf32>
    %126 = vector.broadcast %125 : vector<8x1xf32> to vector<8x8xf32>
    %127 = arith.subf %123, %126 : vector<8x8xf32>
    %128 = math.exp %127 : vector<8x8xf32>
    %cst_75 = arith.constant dense<0.000000e+00> : vector<8xf32>
    %129 = vector.multi_reduction <add>, %128, %cst_75 [1] : vector<8x8xf32> to vector<8xf32>
    %130 = vector.shape_cast %129 : vector<8xf32> to vector<8x1xf32>
    %131 = tpu.reciprocal %130 {approx = true} : vector<8x1xf32> -> vector<8x1xf32>
    %132 = vector.broadcast %131 : vector<8x1xf32> to vector<8x8xf32>
    %133 = arith.mulf %128, %132 : vector<8x8xf32>
    %cst_76 = arith.constant dense<0.000000e+00> : vector<8x8xf32>
    %134 = tpu.matmul %133, %120, %cst_76 {dimension_numbers = #tpu.dot_dimension_numbers<[1], [0], [0], [1], [0, 0, 1, 1], [], []>} : vector<8x8xf32>, vector<8x8xf32>, vector<8x8xf32> -> vector<8x8xf32>
    %135 = vector.extract_strided_slice %56 {offsets = [24, 0], sizes = [8, 32], strides = [1, 1]} : vector<32x32xf32> to vector<8x32xf32>
    %cst_77 = arith.constant dense<0.000000e+00> : vector<8x32xf32>
    %136 = tpu.matmul %134, %135, %cst_77 {dimension_numbers = #tpu.dot_dimension_numbers<[1], [0], [0], [1], [0, 0, 1, 1], [], []>} : vector<8x8xf32>, vector<8x32xf32>, vector<8x32xf32> -> vector<8x32xf32>
    %137 = arith.addf %117, %136 : vector<8x32xf32>
    %138 = arith.addf %22, %137 : vector<8x32xf32>
    %c0_78 = arith.constant 0 : index
    %c0_79 = arith.constant 0 : index
    %c0_80 = arith.constant 0 : index
    %139 = vector.load %arg11[%c0_78, %c0_79, %c0_80] : memref<2x1x32xf32, #tpu.memory_space<vmem>>, vector<1x1x32xf32>
    %140 = vector.shape_cast %139 : vector<1x1x32xf32> to vector<1x32xf32>
    %141 = vector.broadcast %140 : vector<1x32xf32> to vector<8x32xf32>
    %142 = arith.addf %138, %141 : vector<8x32xf32>
    %c0_81 = arith.constant 0 : index
    %c0_82 = arith.constant 0 : index
    %c0_83 = arith.constant 0 : index
    %143 = vector.load %arg12[%c0_81, %c0_82, %c0_83] : memref<2x1x32xf32, #tpu.memory_space<vmem>>, vector<1x1x32xf32>
    %144 = vector.shape_cast %143 : vector<1x1x32xf32> to vector<1x32xf32>
    %c0_84 = arith.constant 0 : index
    %c0_85 = arith.constant 0 : index
    %c0_86 = arith.constant 0 : index
    %145 = vector.load %arg13[%c0_84, %c0_85, %c0_86] : memref<2x1x32xf32, #tpu.memory_space<vmem>>, vector<1x1x32xf32>
    %146 = vector.shape_cast %145 : vector<1x1x32xf32> to vector<1x32xf32>
    %cst_87 = arith.constant dense<0.000000e+00> : vector<8xf32>
    %147 = vector.multi_reduction <add>, %142, %cst_87 [1] : vector<8x32xf32> to vector<8xf32>
    %148 = vector.shape_cast %147 : vector<8xf32> to vector<8x1xf32>
    %cst_88 = arith.constant 3.200000e+01 : f32
    %149 = vector.broadcast %cst_88 : f32 to vector<8x1xf32>
    %150 = arith.divf %148, %149 : vector<8x1xf32>
    %151 = vector.broadcast %150 : vector<8x1xf32> to vector<8x32xf32>
    %152 = arith.subf %142, %151 : vector<8x32xf32>
    %153 = arith.mulf %152, %152 : vector<8x32xf32>
    %cst_89 = arith.constant dense<0.000000e+00> : vector<8xf32>
    %154 = vector.multi_reduction <add>, %153, %cst_89 [1] : vector<8x32xf32> to vector<8xf32>
    %155 = vector.shape_cast %154 : vector<8xf32> to vector<8x1xf32>
    %cst_90 = arith.constant 3.200000e+01 : f32
    %156 = vector.broadcast %cst_90 : f32 to vector<8x1xf32>
    %157 = arith.divf %155, %156 : vector<8x1xf32>
    %cst_91 = arith.constant 9.99999996E-13 : f32
    %158 = vector.broadcast %cst_91 : f32 to vector<8x1xf32>
    %159 = arith.addf %157, %158 : vector<8x1xf32>
    %160 = math.rsqrt %159 : vector<8x1xf32>
    %161 = vector.broadcast %160 : vector<8x1xf32> to vector<8x32xf32>
    %162 = arith.mulf %152, %161 : vector<8x32xf32>
    %163 = vector.broadcast %144 : vector<1x32xf32> to vector<8x32xf32>
    %164 = arith.mulf %162, %163 : vector<8x32xf32>
    %165 = vector.broadcast %146 : vector<1x32xf32> to vector<8x32xf32>
    %166 = arith.addf %164, %165 : vector<8x32xf32>
    %c0_92 = arith.constant 0 : index
    %c0_93 = arith.constant 0 : index
    %c0_94 = arith.constant 0 : index
    %167 = vector.load %arg14[%c0_92, %c0_93, %c0_94] : memref<2x32x64xf32, #tpu.memory_space<vmem>>, vector<1x32x64xf32>
    %168 = vector.shape_cast %167 : vector<1x32x64xf32> to vector<32x64xf32>
    %cst_95 = arith.constant dense<0.000000e+00> : vector<8x64xf32>
    %169 = tpu.matmul %166, %168, %cst_95 {dimension_numbers = #tpu.dot_dimension_numbers<[1], [0], [0], [1], [0, 0, 1, 1], [], []>} : vector<8x32xf32>, vector<32x64xf32>, vector<8x64xf32> -> vector<8x64xf32>
    %c0_96 = arith.constant 0 : index
    %c0_97 = arith.constant 0 : index
    %c0_98 = arith.constant 0 : index
    %170 = vector.load %arg15[%c0_96, %c0_97, %c0_98] : memref<2x1x64xf32, #tpu.memory_space<vmem>>, vector<1x1x64xf32>
    %171 = vector.shape_cast %170 : vector<1x1x64xf32> to vector<1x64xf32>
    %172 = vector.broadcast %171 : vector<1x64xf32> to vector<8x64xf32>
    %173 = arith.addf %169, %172 : vector<8x64xf32>
    %cst_99 = arith.constant 5.000000e-01 : f32
    %174 = vector.broadcast %cst_99 : f32 to vector<8x64xf32>
    %175 = arith.mulf %174, %173 : vector<8x64xf32>
    %cst_100 = arith.constant 0.707106769 : f32
    %176 = vector.broadcast %cst_100 : f32 to vector<8x64xf32>
    %177 = arith.mulf %173, %176 : vector<8x64xf32>
    %178 = math.erf %177 : vector<8x64xf32>
    %cst_101 = arith.constant 1.000000e+00 : f32
    %179 = vector.broadcast %cst_101 : f32 to vector<8x64xf32>
    %180 = arith.addf %179, %178 : vector<8x64xf32>
    %181 = arith.mulf %175, %180 : vector<8x64xf32>
    %c0_102 = arith.constant 0 : index
    %c0_103 = arith.constant 0 : index
    %c0_104 = arith.constant 0 : index
    %182 = vector.load %arg16[%c0_102, %c0_103, %c0_104] : memref<2x64x32xf32, #tpu.memory_space<vmem>>, vector<1x64x32xf32>
    %183 = vector.shape_cast %182 : vector<1x64x32xf32> to vector<64x32xf32>
    %cst_105 = arith.constant dense<0.000000e+00> : vector<8x32xf32>
    %184 = tpu.matmul %181, %183, %cst_105 {dimension_numbers = #tpu.dot_dimension_numbers<[1], [0], [0], [1], [0, 0, 1, 1], [], []>} : vector<8x64xf32>, vector<64x32xf32>, vector<8x32xf32> -> vector<8x32xf32>
    %c0_106 = arith.constant 0 : index
    %c0_107 = arith.constant 0 : index
    %c0_108 = arith.constant 0 : index
    %185 = vector.load %arg17[%c0_106, %c0_107, %c0_108] : memref<2x1x32xf32, #tpu.memory_space<vmem>>, vector<1x1x32xf32>
    %186 = vector.shape_cast %185 : vector<1x1x32xf32> to vector<1x32xf32>
    %187 = vector.broadcast %186 : vector<1x32xf32> to vector<8x32xf32>
    %188 = arith.addf %184, %187 : vector<8x32xf32>
    %189 = arith.addf %142, %188 : vector<8x32xf32>
    %c1_109 = arith.constant 1 : index
    %c0_110 = arith.constant 0 : index
    %c0_111 = arith.constant 0 : index
    %190 = vector.load %arg6[%c1_109, %c0_110, %c0_111] : memref<2x1x32xf32, #tpu.memory_space<vmem>>, vector<1x1x32xf32>
    %191 = vector.shape_cast %190 : vector<1x1x32xf32> to vector<1x32xf32>
    %c1_112 = arith.constant 1 : index
    %c0_113 = arith.constant 0 : index
    %c0_114 = arith.constant 0 : index
    %192 = vector.load %arg7[%c1_112, %c0_113, %c0_114] : memref<2x1x32xf32, #tpu.memory_space<vmem>>, vector<1x1x32xf32>
    %193 = vector.shape_cast %192 : vector<1x1x32xf32> to vector<1x32xf32>
    %cst_115 = arith.constant dense<0.000000e+00> : vector<8xf32>
    %194 = vector.multi_reduction <add>, %189, %cst_115 [1] : vector<8x32xf32> to vector<8xf32>
    %195 = vector.shape_cast %194 : vector<8xf32> to vector<8x1xf32>
    %cst_116 = arith.constant 3.200000e+01 : f32
    %196 = vector.broadcast %cst_116 : f32 to vector<8x1xf32>
    %197 = arith.divf %195, %196 : vector<8x1xf32>
    %198 = vector.broadcast %197 : vector<8x1xf32> to vector<8x32xf32>
    %199 = arith.subf %189, %198 : vector<8x32xf32>
    %200 = arith.mulf %199, %199 : vector<8x32xf32>
    %cst_117 = arith.constant dense<0.000000e+00> : vector<8xf32>
    %201 = vector.multi_reduction <add>, %200, %cst_117 [1] : vector<8x32xf32> to vector<8xf32>
    %202 = vector.shape_cast %201 : vector<8xf32> to vector<8x1xf32>
    %cst_118 = arith.constant 3.200000e+01 : f32
    %203 = vector.broadcast %cst_118 : f32 to vector<8x1xf32>
    %204 = arith.divf %202, %203 : vector<8x1xf32>
    %cst_119 = arith.constant 9.99999996E-13 : f32
    %205 = vector.broadcast %cst_119 : f32 to vector<8x1xf32>
    %206 = arith.addf %204, %205 : vector<8x1xf32>
    %207 = math.rsqrt %206 : vector<8x1xf32>
    %208 = vector.broadcast %207 : vector<8x1xf32> to vector<8x32xf32>
    %209 = arith.mulf %199, %208 : vector<8x32xf32>
    %210 = vector.broadcast %191 : vector<1x32xf32> to vector<8x32xf32>
    %211 = arith.mulf %209, %210 : vector<8x32xf32>
    %212 = vector.broadcast %193 : vector<1x32xf32> to vector<8x32xf32>
    %213 = arith.addf %211, %212 : vector<8x32xf32>
    %c1_120 = arith.constant 1 : index
    %c0_121 = arith.constant 0 : index
    %c0_122 = arith.constant 0 : index
    %214 = vector.load %arg8[%c1_120, %c0_121, %c0_122] : memref<2x32x96xf32, #tpu.memory_space<vmem>>, vector<1x32x96xf32>
    %215 = vector.shape_cast %214 : vector<1x32x96xf32> to vector<32x96xf32>
    %cst_123 = arith.constant dense<0.000000e+00> : vector<8x96xf32>
    %216 = tpu.matmul %213, %215, %cst_123 {dimension_numbers = #tpu.dot_dimension_numbers<[1], [0], [0], [1], [0, 0, 1, 1], [], []>} : vector<8x32xf32>, vector<32x96xf32>, vector<8x96xf32> -> vector<8x96xf32>
    %c1_124 = arith.constant 1 : index
    %c0_125 = arith.constant 0 : index
    %c0_126 = arith.constant 0 : index
    %217 = vector.load %arg9[%c1_124, %c0_125, %c0_126] : memref<2x1x96xf32, #tpu.memory_space<vmem>>, vector<1x1x96xf32>
    %218 = vector.shape_cast %217 : vector<1x1x96xf32> to vector<1x96xf32>
    %219 = vector.broadcast %218 : vector<1x96xf32> to vector<8x96xf32>
    %220 = arith.addf %216, %219 : vector<8x96xf32>
    %c0_127 = arith.constant 0 : index
    %c0_128 = arith.constant 0 : index
    %221 = vector.load %arg24[%c0_127, %c0_128] : memref<8x96xf32, #tpu.memory_space<vmem>>, vector<8x96xf32>
    tpu.vector_store %arg24[%c0_127, %c0_128], %220 {strides = array<i32>} : memref<8x96xf32, #tpu.memory_space<vmem>>, vector<8x96xf32>,
    %c1_129 = arith.constant 1 : index
    %c0_130 = arith.constant 0 : index
    %c0_131 = arith.constant 0 : index
    %222 = vector.load %arg10[%c1_129, %c0_130, %c0_131] : memref<2x32x32xf32, #tpu.memory_space<vmem>>, vector<1x32x32xf32>
    %223 = vector.shape_cast %222 : vector<1x32x32xf32> to vector<32x32xf32>
    %cst_132 = arith.constant 0.000000e+00 : f32
    %224 = vector.broadcast %cst_132 : f32 to vector<8x32xf32>
    %c0_133 = arith.constant 0 : index
    %c0_134 = arith.constant 0 : index
    %225 = vector.load %arg24[%c0_133, %c0_134] : memref<8x96xf32, #tpu.memory_space<vmem>>, vector<8x8xf32>
    %c0_135 = arith.constant 0 : index
    %c32_136 = arith.constant 32 : index
    %226 = vector.load %arg24[%c0_135, %c32_136] : memref<8x96xf32, #tpu.memory_space<vmem>>, vector<8x8xf32>
    %c0_137 = arith.constant 0 : index
    %c64_138 = arith.constant 64 : index
    %227 = vector.load %arg24[%c0_137, %c64_138] : memref<8x96xf32, #tpu.memory_space<vmem>>, vector<8x8xf32>
    %cst_139 = arith.constant dense<0.000000e+00> : vector<8x8xf32>
    %228 = tpu.matmul %225, %226, %cst_139 {dimension_numbers = #tpu.dot_dimension_numbers<[1], [1], [0], [0], [0, 0, 1, 0], [], []>} : vector<8x8xf32>, vector<8x8xf32>, vector<8x8xf32> -> vector<8x8xf32>
    %229 = vector.broadcast %5 : vector<1x8xf32> to vector<8x8xf32>
    %230 = arith.addf %228, %229 : vector<8x8xf32>
    %cst_140 = arith.constant dense<0xFF800000> : vector<8xf32>
    %231 = vector.multi_reduction <maximumf>, %230, %cst_140 [1] : vector<8x8xf32> to vector<8xf32>
    %232 = vector.shape_cast %231 : vector<8xf32> to vector<8x1xf32>
    %233 = vector.broadcast %232 : vector<8x1xf32> to vector<8x8xf32>
    %234 = arith.subf %230, %233 : vector<8x8xf32>
    %235 = math.exp %234 : vector<8x8xf32>
    %cst_141 = arith.constant dense<0.000000e+00> : vector<8xf32>
    %236 = vector.multi_reduction <add>, %235, %cst_141 [1] : vector<8x8xf32> to vector<8xf32>
    %237 = vector.shape_cast %236 : vector<8xf32> to vector<8x1xf32>
    %238 = tpu.reciprocal %237 {approx = true} : vector<8x1xf32> -> vector<8x1xf32>
    %239 = vector.broadcast %238 : vector<8x1xf32> to vector<8x8xf32>
    %240 = arith.mulf %235, %239 : vector<8x8xf32>
    %cst_142 = arith.constant dense<0.000000e+00> : vector<8x8xf32>
    %241 = tpu.matmul %240, %227, %cst_142 {dimension_numbers = #tpu.dot_dimension_numbers<[1], [0], [0], [1], [0, 0, 1, 1], [], []>} : vector<8x8xf32>, vector<8x8xf32>, vector<8x8xf32> -> vector<8x8xf32>
    %242 = vector.extract_strided_slice %223 {offsets = [0, 0], sizes = [8, 32], strides = [1, 1]} : vector<32x32xf32> to vector<8x32xf32>
    %cst_143 = arith.constant dense<0.000000e+00> : vector<8x32xf32>
    %243 = tpu.matmul %241, %242, %cst_143 {dimension_numbers = #tpu.dot_dimension_numbers<[1], [0], [0], [1], [0, 0, 1, 1], [], []>} : vector<8x8xf32>, vector<8x32xf32>, vector<8x32xf32> -> vector<8x32xf32>
    %244 = arith.addf %224, %243 : vector<8x32xf32>
    %c0_144 = arith.constant 0 : index
    %c8_145 = arith.constant 8 : index
    %245 = vector.load %arg24[%c0_144, %c8_145] : memref<8x96xf32, #tpu.memory_space<vmem>>, vector<8x8xf32>
    %c0_146 = arith.constant 0 : index
    %c40_147 = arith.constant 40 : index
    %246 = vector.load %arg24[%c0_146, %c40_147] : memref<8x96xf32, #tpu.memory_space<vmem>>, vector<8x8xf32>
    %c0_148 = arith.constant 0 : index
    %c72_149 = arith.constant 72 : index
    %247 = vector.load %arg24[%c0_148, %c72_149] : memref<8x96xf32, #tpu.memory_space<vmem>>, vector<8x8xf32>
    %cst_150 = arith.constant dense<0.000000e+00> : vector<8x8xf32>
    %248 = tpu.matmul %245, %246, %cst_150 {dimension_numbers = #tpu.dot_dimension_numbers<[1], [1], [0], [0], [0, 0, 1, 0], [], []>} : vector<8x8xf32>, vector<8x8xf32>, vector<8x8xf32> -> vector<8x8xf32>
    %249 = vector.broadcast %5 : vector<1x8xf32> to vector<8x8xf32>
    %250 = arith.addf %248, %249 : vector<8x8xf32>
    %cst_151 = arith.constant dense<0xFF800000> : vector<8xf32>
    %251 = vector.multi_reduction <maximumf>, %250, %cst_151 [1] : vector<8x8xf32> to vector<8xf32>
    %252 = vector.shape_cast %251 : vector<8xf32> to vector<8x1xf32>
    %253 = vector.broadcast %252 : vector<8x1xf32> to vector<8x8xf32>
    %254 = arith.subf %250, %253 : vector<8x8xf32>
    %255 = math.exp %254 : vector<8x8xf32>
    %cst_152 = arith.constant dense<0.000000e+00> : vector<8xf32>
    %256 = vector.multi_reduction <add>, %255, %cst_152 [1] : vector<8x8xf32> to vector<8xf32>
    %257 = vector.shape_cast %256 : vector<8xf32> to vector<8x1xf32>
    %258 = tpu.reciprocal %257 {approx = true} : vector<8x1xf32> -> vector<8x1xf32>
    %259 = vector.broadcast %258 : vector<8x1xf32> to vector<8x8xf32>
    %260 = arith.mulf %255, %259 : vector<8x8xf32>
    %cst_153 = arith.constant dense<0.000000e+00> : vector<8x8xf32>
    %261 = tpu.matmul %260, %247, %cst_153 {dimension_numbers = #tpu.dot_dimension_numbers<[1], [0], [0], [1], [0, 0, 1, 1], [], []>} : vector<8x8xf32>, vector<8x8xf32>, vector<8x8xf32> -> vector<8x8xf32>
    %262 = vector.extract_strided_slice %223 {offsets = [8, 0], sizes = [8, 32], strides = [1, 1]} : vector<32x32xf32> to vector<8x32xf32>
    %cst_154 = arith.constant dense<0.000000e+00> : vector<8x32xf32>
    %263 = tpu.matmul %261, %262, %cst_154 {dimension_numbers = #tpu.dot_dimension_numbers<[1], [0], [0], [1], [0, 0, 1, 1], [], []>} : vector<8x8xf32>, vector<8x32xf32>, vector<8x32xf32> -> vector<8x32xf32>
    %264 = arith.addf %244, %263 : vector<8x32xf32>
    %c0_155 = arith.constant 0 : index
    %c16_156 = arith.constant 16 : index
    %265 = vector.load %arg24[%c0_155, %c16_156] : memref<8x96xf32, #tpu.memory_space<vmem>>, vector<8x8xf32>
    %c0_157 = arith.constant 0 : index
    %c48_158 = arith.constant 48 : index
    %266 = vector.load %arg24[%c0_157, %c48_158] : memref<8x96xf32, #tpu.memory_space<vmem>>, vector<8x8xf32>
    %c0_159 = arith.constant 0 : index
    %c80_160 = arith.constant 80 : index
    %267 = vector.load %arg24[%c0_159, %c80_160] : memref<8x96xf32, #tpu.memory_space<vmem>>, vector<8x8xf32>
    %cst_161 = arith.constant dense<0.000000e+00> : vector<8x8xf32>
    %268 = tpu.matmul %265, %266, %cst_161 {dimension_numbers = #tpu.dot_dimension_numbers<[1], [1], [0], [0], [0, 0, 1, 0], [], []>} : vector<8x8xf32>, vector<8x8xf32>, vector<8x8xf32> -> vector<8x8xf32>
    %269 = vector.broadcast %5 : vector<1x8xf32> to vector<8x8xf32>
    %270 = arith.addf %268, %269 : vector<8x8xf32>
    %cst_162 = arith.constant dense<0xFF800000> : vector<8xf32>
    %271 = vector.multi_reduction <maximumf>, %270, %cst_162 [1] : vector<8x8xf32> to vector<8xf32>
    %272 = vector.shape_cast %271 : vector<8xf32> to vector<8x1xf32>
    %273 = vector.broadcast %272 : vector<8x1xf32> to vector<8x8xf32>
    %274 = arith.subf %270, %273 : vector<8x8xf32>
    %275 = math.exp %274 : vector<8x8xf32>
    %cst_163 = arith.constant dense<0.000000e+00> : vector<8xf32>
    %276 = vector.multi_reduction <add>, %275, %cst_163 [1] : vector<8x8xf32> to vector<8xf32>
    %277 = vector.shape_cast %276 : vector<8xf32> to vector<8x1xf32>
    %278 = tpu.reciprocal %277 {approx = true} : vector<8x1xf32> -> vector<8x1xf32>
    %279 = vector.broadcast %278 : vector<8x1xf32> to vector<8x8xf32>
    %280 = arith.mulf %275, %279 : vector<8x8xf32>
    %cst_164 = arith.constant dense<0.000000e+00> : vector<8x8xf32>
    %281 = tpu.matmul %280, %267, %cst_164 {dimension_numbers = #tpu.dot_dimension_numbers<[1], [0], [0], [1], [0, 0, 1, 1], [], []>} : vector<8x8xf32>, vector<8x8xf32>, vector<8x8xf32> -> vector<8x8xf32>
    %282 = vector.extract_strided_slice %223 {offsets = [16, 0], sizes = [8, 32], strides = [1, 1]} : vector<32x32xf32> to vector<8x32xf32>
    %cst_165 = arith.constant dense<0.000000e+00> : vector<8x32xf32>
    %283 = tpu.matmul %281, %282, %cst_165 {dimension_numbers = #tpu.dot_dimension_numbers<[1], [0], [0], [1], [0, 0, 1, 1], [], []>} : vector<8x8xf32>, vector<8x32xf32>, vector<8x32xf32> -> vector<8x32xf32>
    %284 = arith.addf %264, %283 : vector<8x32xf32>
    %c0_166 = arith.constant 0 : index
    %c24_167 = arith.constant 24 : index
    %285 = vector.load %arg24[%c0_166, %c24_167] : memref<8x96xf32, #tpu.memory_space<vmem>>, vector<8x8xf32>
    %c0_168 = arith.constant 0 : index
    %c56_169 = arith.constant 56 : index
    %286 = vector.load %arg24[%c0_168, %c56_169] : memref<8x96xf32, #tpu.memory_space<vmem>>, vector<8x8xf32>
    %c0_170 = arith.constant 0 : index
    %c88_171 = arith.constant 88 : index
    %287 = vector.load %arg24[%c0_170, %c88_171] : memref<8x96xf32, #tpu.memory_space<vmem>>, vector<8x8xf32>
    %cst_172 = arith.constant dense<0.000000e+00> : vector<8x8xf32>
    %288 = tpu.matmul %285, %286, %cst_172 {dimension_numbers = #tpu.dot_dimension_numbers<[1], [1], [0], [0], [0, 0, 1, 0], [], []>} : vector<8x8xf32>, vector<8x8xf32>, vector<8x8xf32> -> vector<8x8xf32>
    %289 = vector.broadcast %5 : vector<1x8xf32> to vector<8x8xf32>
    %290 = arith.addf %288, %289 : vector<8x8xf32>
    %cst_173 = arith.constant dense<0xFF800000> : vector<8xf32>
    %291 = vector.multi_reduction <maximumf>, %290, %cst_173 [1] : vector<8x8xf32> to vector<8xf32>
    %292 = vector.shape_cast %291 : vector<8xf32> to vector<8x1xf32>
    %293 = vector.broadcast %292 : vector<8x1xf32> to vector<8x8xf32>
    %294 = arith.subf %290, %293 : vector<8x8xf32>
    %295 = math.exp %294 : vector<8x8xf32>
    %cst_174 = arith.constant dense<0.000000e+00> : vector<8xf32>
    %296 = vector.multi_reduction <add>, %295, %cst_174 [1] : vector<8x8xf32> to vector<8xf32>
    %297 = vector.shape_cast %296 : vector<8xf32> to vector<8x1xf32>
    %298 = tpu.reciprocal %297 {approx = true} : vector<8x1xf32> -> vector<8x1xf32>
    %299 = vector.broadcast %298 : vector<8x1xf32> to vector<8x8xf32>
    %300 = arith.mulf %295, %299 : vector<8x8xf32>
    %cst_175 = arith.constant dense<0.000000e+00> : vector<8x8xf32>
    %301 = tpu.matmul %300, %287, %cst_175 {dimension_numbers = #tpu.dot_dimension_numbers<[1], [0], [0], [1], [0, 0, 1, 1], [], []>} : vector<8x8xf32>, vector<8x8xf32>, vector<8x8xf32> -> vector<8x8xf32>
    %302 = vector.extract_strided_slice %223 {offsets = [24, 0], sizes = [8, 32], strides = [1, 1]} : vector<32x32xf32> to vector<8x32xf32>
    %cst_176 = arith.constant dense<0.000000e+00> : vector<8x32xf32>
    %303 = tpu.matmul %301, %302, %cst_176 {dimension_numbers = #tpu.dot_dimension_numbers<[1], [0], [0], [1], [0, 0, 1, 1], [], []>} : vector<8x8xf32>, vector<8x32xf32>, vector<8x32xf32> -> vector<8x32xf32>
    %304 = arith.addf %284, %303 : vector<8x32xf32>
    %305 = arith.addf %189, %304 : vector<8x32xf32>
    %c1_177 = arith.constant 1 : index
    %c0_178 = arith.constant 0 : index
    %c0_179 = arith.constant 0 : index
    %306 = vector.load %arg11[%c1_177, %c0_178, %c0_179] : memref<2x1x32xf32, #tpu.memory_space<vmem>>, vector<1x1x32xf32>
    %307 = vector.shape_cast %306 : vector<1x1x32xf32> to vector<1x32xf32>
    %308 = vector.broadcast %307 : vector<1x32xf32> to vector<8x32xf32>
    %309 = arith.addf %305, %308 : vector<8x32xf32>
    %c1_180 = arith.constant 1 : index
    %c0_181 = arith.constant 0 : index
    %c0_182 = arith.constant 0 : index
    %310 = vector.load %arg12[%c1_180, %c0_181, %c0_182] : memref<2x1x32xf32, #tpu.memory_space<vmem>>, vector<1x1x32xf32>
    %311 = vector.shape_cast %310 : vector<1x1x32xf32> to vector<1x32xf32>
    %c1_183 = arith.constant 1 : index
    %c0_184 = arith.constant 0 : index
    %c0_185 = arith.constant 0 : index
    %312 = vector.load %arg13[%c1_183, %c0_184, %c0_185] : memref<2x1x32xf32, #tpu.memory_space<vmem>>, vector<1x1x32xf32>
    %313 = vector.shape_cast %312 : vector<1x1x32xf32> to vector<1x32xf32>
    %cst_186 = arith.constant dense<0.000000e+00> : vector<8xf32>
    %314 = vector.multi_reduction <add>, %309, %cst_186 [1] : vector<8x32xf32> to vector<8xf32>
    %315 = vector.shape_cast %314 : vector<8xf32> to vector<8x1xf32>
    %cst_187 = arith.constant 3.200000e+01 : f32
    %316 = vector.broadcast %cst_187 : f32 to vector<8x1xf32>
    %317 = arith.divf %315, %316 : vector<8x1xf32>
    %318 = vector.broadcast %317 : vector<8x1xf32> to vector<8x32xf32>
    %319 = arith.subf %309, %318 : vector<8x32xf32>
    %320 = arith.mulf %319, %319 : vector<8x32xf32>
    %cst_188 = arith.constant dense<0.000000e+00> : vector<8xf32>
    %321 = vector.multi_reduction <add>, %320, %cst_188 [1] : vector<8x32xf32> to vector<8xf32>
    %322 = vector.shape_cast %321 : vector<8xf32> to vector<8x1xf32>
    %cst_189 = arith.constant 3.200000e+01 : f32
    %323 = vector.broadcast %cst_189 : f32 to vector<8x1xf32>
    %324 = arith.divf %322, %323 : vector<8x1xf32>
    %cst_190 = arith.constant 9.99999996E-13 : f32
    %325 = vector.broadcast %cst_190 : f32 to vector<8x1xf32>
    %326 = arith.addf %324, %325 : vector<8x1xf32>
    %327 = math.rsqrt %326 : vector<8x1xf32>
    %328 = vector.broadcast %327 : vector<8x1xf32> to vector<8x32xf32>
    %329 = arith.mulf %319, %328 : vector<8x32xf32>
    %330 = vector.broadcast %311 : vector<1x32xf32> to vector<8x32xf32>
    %331 = arith.mulf %329, %330 : vector<8x32xf32>
    %332 = vector.broadcast %313 : vector<1x32xf32> to vector<8x32xf32>
    %333 = arith.addf %331, %332 : vector<8x32xf32>
    %c1_191 = arith.constant 1 : index
    %c0_192 = arith.constant 0 : index
    %c0_193 = arith.constant 0 : index
    %334 = vector.load %arg14[%c1_191, %c0_192, %c0_193] : memref<2x32x64xf32, #tpu.memory_space<vmem>>, vector<1x32x64xf32>
    %335 = vector.shape_cast %334 : vector<1x32x64xf32> to vector<32x64xf32>
    %cst_194 = arith.constant dense<0.000000e+00> : vector<8x64xf32>
    %336 = tpu.matmul %333, %335, %cst_194 {dimension_numbers = #tpu.dot_dimension_numbers<[1], [0], [0], [1], [0, 0, 1, 1], [], []>} : vector<8x32xf32>, vector<32x64xf32>, vector<8x64xf32> -> vector<8x64xf32>
    %c1_195 = arith.constant 1 : index
    %c0_196 = arith.constant 0 : index
    %c0_197 = arith.constant 0 : index
    %337 = vector.load %arg15[%c1_195, %c0_196, %c0_197] : memref<2x1x64xf32, #tpu.memory_space<vmem>>, vector<1x1x64xf32>
    %338 = vector.shape_cast %337 : vector<1x1x64xf32> to vector<1x64xf32>
    %339 = vector.broadcast %338 : vector<1x64xf32> to vector<8x64xf32>
    %340 = arith.addf %336, %339 : vector<8x64xf32>
    %cst_198 = arith.constant 5.000000e-01 : f32
    %341 = vector.broadcast %cst_198 : f32 to vector<8x64xf32>
    %342 = arith.mulf %341, %340 : vector<8x64xf32>
    %cst_199 = arith.constant 0.707106769 : f32
    %343 = vector.broadcast %cst_199 : f32 to vector<8x64xf32>
    %344 = arith.mulf %340, %343 : vector<8x64xf32>
    %345 = math.erf %344 : vector<8x64xf32>
    %cst_200 = arith.constant 1.000000e+00 : f32
    %346 = vector.broadcast %cst_200 : f32 to vector<8x64xf32>
    %347 = arith.addf %346, %345 : vector<8x64xf32>
    %348 = arith.mulf %342, %347 : vector<8x64xf32>
    %c1_201 = arith.constant 1 : index
    %c0_202 = arith.constant 0 : index
    %c0_203 = arith.constant 0 : index
    %349 = vector.load %arg16[%c1_201, %c0_202, %c0_203] : memref<2x64x32xf32, #tpu.memory_space<vmem>>, vector<1x64x32xf32>
    %350 = vector.shape_cast %349 : vector<1x64x32xf32> to vector<64x32xf32>
    %cst_204 = arith.constant dense<0.000000e+00> : vector<8x32xf32>
    %351 = tpu.matmul %348, %350, %cst_204 {dimension_numbers = #tpu.dot_dimension_numbers<[1], [0], [0], [1], [0, 0, 1, 1], [], []>} : vector<8x64xf32>, vector<64x32xf32>, vector<8x32xf32> -> vector<8x32xf32>
    %c1_205 = arith.constant 1 : index
    %c0_206 = arith.constant 0 : index
    %c0_207 = arith.constant 0 : index
    %352 = vector.load %arg17[%c1_205, %c0_206, %c0_207] : memref<2x1x32xf32, #tpu.memory_space<vmem>>, vector<1x1x32xf32>
    %353 = vector.shape_cast %352 : vector<1x1x32xf32> to vector<1x32xf32>
    %354 = vector.broadcast %353 : vector<1x32xf32> to vector<8x32xf32>
    %355 = arith.addf %351, %354 : vector<8x32xf32>
    %356 = arith.addf %309, %355 : vector<8x32xf32>
    %c0_208 = arith.constant 0 : index
    %c0_209 = arith.constant 0 : index
    %357 = vector.load %arg18[%c0_208, %c0_209] : memref<1x32xf32, #tpu.memory_space<vmem>>, vector<1x32xf32>
    %c0_210 = arith.constant 0 : index
    %c0_211 = arith.constant 0 : index
    %358 = vector.load %arg19[%c0_210, %c0_211] : memref<1x32xf32, #tpu.memory_space<vmem>>, vector<1x32xf32>
    %cst_212 = arith.constant dense<0.000000e+00> : vector<8xf32>
    %359 = vector.multi_reduction <add>, %356, %cst_212 [1] : vector<8x32xf32> to vector<8xf32>
    %360 = vector.shape_cast %359 : vector<8xf32> to vector<8x1xf32>
    %cst_213 = arith.constant 3.200000e+01 : f32
    %361 = vector.broadcast %cst_213 : f32 to vector<8x1xf32>
    %362 = arith.divf %360, %361 : vector<8x1xf32>
    %363 = vector.broadcast %362 : vector<8x1xf32> to vector<8x32xf32>
    %364 = arith.subf %356, %363 : vector<8x32xf32>
    %365 = arith.mulf %364, %364 : vector<8x32xf32>
    %cst_214 = arith.constant dense<0.000000e+00> : vector<8xf32>
    %366 = vector.multi_reduction <add>, %365, %cst_214 [1] : vector<8x32xf32> to vector<8xf32>
    %367 = vector.shape_cast %366 : vector<8xf32> to vector<8x1xf32>
    %cst_215 = arith.constant 3.200000e+01 : f32
    %368 = vector.broadcast %cst_215 : f32 to vector<8x1xf32>
    %369 = arith.divf %367, %368 : vector<8x1xf32>
    %cst_216 = arith.constant 9.99999996E-13 : f32
    %370 = vector.broadcast %cst_216 : f32 to vector<8x1xf32>
    %371 = arith.addf %369, %370 : vector<8x1xf32>
    %372 = math.rsqrt %371 : vector<8x1xf32>
    %373 = vector.broadcast %372 : vector<8x1xf32> to vector<8x32xf32>
    %374 = arith.mulf %364, %373 : vector<8x32xf32>
    %375 = vector.broadcast %357 : vector<1x32xf32> to vector<8x32xf32>
    %376 = arith.mulf %374, %375 : vector<8x32xf32>
    %377 = vector.broadcast %358 : vector<1x32xf32> to vector<8x32xf32>
    %378 = arith.addf %376, %377 : vector<8x32xf32>
    %c0_217 = arith.constant 0 : index
    %c0_218 = arith.constant 0 : index
    %379 = vector.load %arg20[%c0_217, %c0_218] : memref<32x128xf32, #tpu.memory_space<vmem>>, vector<32x128xf32>
    %cst_219 = arith.constant dense<0.000000e+00> : vector<8x128xf32>
    %380 = tpu.matmul %378, %379, %cst_219 {dimension_numbers = #tpu.dot_dimension_numbers<[1], [0], [0], [1], [0, 0, 1, 1], [], []>} : vector<8x32xf32>, vector<32x128xf32>, vector<8x128xf32> -> vector<8x128xf32>
    %c0_220 = arith.constant 0 : index
    %c0_221 = arith.constant 0 : index
    %381 = vector.load %arg21[%c0_220, %c0_221] : memref<1x128xf32, #tpu.memory_space<vmem>>, vector<1x128xf32>
    %382 = vector.broadcast %381 : vector<1x128xf32> to vector<8x128xf32>
    %383 = arith.addf %380, %382 : vector<8x128xf32>
    %c0_222 = arith.constant 0 : index
    %c0_223 = arith.constant 0 : index
    %c0_224 = arith.constant 0 : index
    %384 = vector.load %arg22[%c0_222, %c0_223, %c0_224] : memref<1x8x128xf32, #tpu.memory_space<vmem>>, vector<1x8x128xf32>
    %385 = vector.shape_cast %384 : vector<1x8x128xf32> to vector<8x128xf32>
    %386 = vector.shape_cast %383 : vector<8x128xf32> to vector<1x8x128xf32>
    tpu.vector_store %arg22[%c0_222, %c0_223, %c0_224], %386 {strides = array<i32>} : memref<1x8x128xf32, #tpu.memory_space<vmem>>, vector<1x8x128xf32>,
    return
  }
  func.func @transform_0(%arg0: i32) -> (i32, i32, i32) {
    %c0_i32 = arith.constant 0 : i32
    %c0_i32_0 = arith.constant 0 : i32
    %c0_i32_1 = arith.constant 0 : i32
    return %arg0, %c0_i32, %c0_i32_0 : i32, i32, i32
  }
  func.func @transform_1(%arg0: i32) -> (i32, i32) {
    %c0_i32 = arith.constant 0 : i32
    %c0_i32_0 = arith.constant 0 : i32
    %c0_i32_1 = arith.constant 0 : i32
    return %c0_i32, %c0_i32_0 : i32, i32
  }
  func.func @transform_2(%arg0: i32) -> (i32, i32) {
    %c0_i32 = arith.constant 0 : i32
    %c0_i32_0 = arith.constant 0 : i32
    %c0_i32_1 = arith.constant 0 : i32
    return %c0_i32, %c0_i32_0 : i32, i32
  }
  func.func @transform_3(%arg0: i32) -> (i32, i32) {
    %c0_i32 = arith.constant 0 : i32
    %c0_i32_0 = arith.constant 0 : i32
    %c0_i32_1 = arith.constant 0 : i32
    return %c0_i32, %c0_i32_0 : i32, i32
  }
  func.func @transform_4(%arg0: i32) -> (i32, i32) {
    %c0_i32 = arith.constant 0 : i32
    %c0_i32_0 = arith.constant 0 : i32
    %c0_i32_1 = arith.constant 0 : i32
    return %c0_i32, %c0_i32_0 : i32, i32
  }
  func.func @transform_5(%arg0: i32) -> (i32, i32, i32) {
    %c0_i32 = arith.constant 0 : i32
    %c0_i32_0 = arith.constant 0 : i32
    %c0_i32_1 = arith.constant 0 : i32
    %c0_i32_2 = arith.constant 0 : i32
    return %c0_i32, %c0_i32_0, %c0_i32_1 : i32, i32, i32
  }
  func.func @transform_6(%arg0: i32) -> (i32, i32, i32) {
    %c0_i32 = arith.constant 0 : i32
    %c0_i32_0 = arith.constant 0 : i32
    %c0_i32_1 = arith.constant 0 : i32
    %c0_i32_2 = arith.constant 0 : i32
    return %c0_i32, %c0_i32_0, %c0_i32_1 : i32, i32, i32
  }
  func.func @transform_7(%arg0: i32) -> (i32, i32, i32) {
    %c0_i32 = arith.constant 0 : i32
    %c0_i32_0 = arith.constant 0 : i32
    %c0_i32_1 = arith.constant 0 : i32
    %c0_i32_2 = arith.constant 0 : i32
    return %c0_i32, %c0_i32_0, %c0_i32_1 : i32, i32, i32
  }
  func.func @transform_8(%arg0: i32) -> (i32, i32, i32) {
    %c0_i32 = arith.constant 0 : i32
    %c0_i32_0 = arith.constant 0 : i32
    %c0_i32_1 = arith.constant 0 : i32
    %c0_i32_2 = arith.constant 0 : i32
    return %c0_i32, %c0_i32_0, %c0_i32_1 : i32, i32, i32
  }
  func.func @transform_9(%arg0: i32) -> (i32, i32, i32) {
    %c0_i32 = arith.constant 0 : i32
    %c0_i32_0 = arith.constant 0 : i32
    %c0_i32_1 = arith.constant 0 : i32
    %c0_i32_2 = arith.constant 0 : i32
    return %c0_i32, %c0_i32_0, %c0_i32_1 : i32, i32, i32
  }
  func.func @transform_10(%arg0: i32) -> (i32, i32, i32) {
    %c0_i32 = arith.constant 0 : i32
    %c0_i32_0 = arith.constant 0 : i32
    %c0_i32_1 = arith.constant 0 : i32
    %c0_i32_2 = arith.constant 0 : i32
    return %c0_i32, %c0_i32_0, %c0_i32_1 : i32, i32, i32
  }
  func.func @transform_11(%arg0: i32) -> (i32, i32, i32) {
    %c0_i32 = arith.constant 0 : i32
    %c0_i32_0 = arith.constant 0 : i32
    %c0_i32_1 = arith.constant 0 : i32
    %c0_i32_2 = arith.constant 0 : i32
    return %c0_i32, %c0_i32_0, %c0_i32_1 : i32, i32, i32
  }
  func.func @transform_12(%arg0: i32) -> (i32, i32, i32) {
    %c0_i32 = arith.constant 0 : i32
    %c0_i32_0 = arith.constant 0 : i32
    %c0_i32_1 = arith.constant 0 : i32
    %c0_i32_2 = arith.constant 0 : i32
    return %c0_i32, %c0_i32_0, %c0_i32_1 : i32, i32, i32
  }
  func.func @transform_13(%arg0: i32) -> (i32, i32, i32) {
    %c0_i32 = arith.constant 0 : i32
    %c0_i32_0 = arith.constant 0 : i32
    %c0_i32_1 = arith.constant 0 : i32
    %c0_i32_2 = arith.constant 0 : i32
    return %c0_i32, %c0_i32_0, %c0_i32_1 : i32, i32, i32
  }
  func.func @transform_14(%arg0: i32) -> (i32, i32, i32) {
    %c0_i32 = arith.constant 0 : i32
    %c0_i32_0 = arith.constant 0 : i32
    %c0_i32_1 = arith.constant 0 : i32
    %c0_i32_2 = arith.constant 0 : i32
    return %c0_i32, %c0_i32_0, %c0_i32_1 : i32, i32, i32
  }
  func.func @transform_15(%arg0: i32) -> (i32, i32, i32) {
    %c0_i32 = arith.constant 0 : i32
    %c0_i32_0 = arith.constant 0 : i32
    %c0_i32_1 = arith.constant 0 : i32
    %c0_i32_2 = arith.constant 0 : i32
    return %c0_i32, %c0_i32_0, %c0_i32_1 : i32, i32, i32
  }
  func.func @transform_16(%arg0: i32) -> (i32, i32, i32) {
    %c0_i32 = arith.constant 0 : i32
    %c0_i32_0 = arith.constant 0 : i32
    %c0_i32_1 = arith.constant 0 : i32
    %c0_i32_2 = arith.constant 0 : i32
    return %c0_i32, %c0_i32_0, %c0_i32_1 : i32, i32, i32
  }
  func.func @transform_17(%arg0: i32) -> (i32, i32) {
    %c0_i32 = arith.constant 0 : i32
    %c0_i32_0 = arith.constant 0 : i32
    %c0_i32_1 = arith.constant 0 : i32
    return %c0_i32, %c0_i32_0 : i32, i32
  }
  func.func @transform_18(%arg0: i32) -> (i32, i32) {
    %c0_i32 = arith.constant 0 : i32
    %c0_i32_0 = arith.constant 0 : i32
    %c0_i32_1 = arith.constant 0 : i32
    return %c0_i32, %c0_i32_0 : i32, i32
  }
  func.func @transform_19(%arg0: i32) -> (i32, i32) {
    %c0_i32 = arith.constant 0 : i32
    %c0_i32_0 = arith.constant 0 : i32
    %c0_i32_1 = arith.constant 0 : i32
    return %c0_i32, %c0_i32_0 : i32, i32
  }
  func.func @transform_20(%arg0: i32) -> (i32, i32) {
    %c0_i32 = arith.constant 0 : i32
    %c0_i32_0 = arith.constant 0 : i32
    %c0_i32_1 = arith.constant 0 : i32
    return %c0_i32, %c0_i32_0 : i32, i32
  }
  func.func @transform_21(%arg0: i32) -> (i32, i32, i32) {
    %c0_i32 = arith.constant 0 : i32
    %c0_i32_0 = arith.constant 0 : i32
    %c0_i32_1 = arith.constant 0 : i32
    return %arg0, %c0_i32, %c0_i32_0 : i32, i32, i32
  }
}

</mosaic_0001>

<bundles_post_ra>
// kernel: vit_for_bengali_ocr.1
= control target key start
LH: loop header
LB: loop body
LE: loop exit
PB: predicated region body
PF: predicated region fallthrough
CT: control target
= control target key end

     0   :  { %s3181_s0 = inlined_call_operand.vmem [shape: f32[2,4,768], index: 0, kind: input, shape index: {}]   ;;  %s3182_s1 = inlined_call_operand.vmem [shape: f32[768,32], index: 1, kind: input, shape index: {}]   ;;  %s3183_s2 = inlined_call_operand.vmem [shape: f32[1,32], index: 2, kind: input, shape index: {}]   ;;  %s3184_s3 = inlined_call_operand.vmem [shape: f32[1,32], index: 3, kind: input, shape index: {}]   ;;  %s3185_s4 = inlined_call_operand.vmem [shape: f32[5,32], index: 4, kind: input, shape index: {}]   ;;  %s3186_s5 = inlined_call_operand.vmem [shape: f32[2,1,32], index: 5, kind: input, shape index: {}]   ;;  %s3187_s6 = inlined_call_operand.vmem [shape: f32[2,1,32], index: 6, kind: input, shape index: {}]   ;;  %s3188_s7 = inlined_call_operand.vmem [shape: f32[2,32,96], index: 7, kind: input, shape index: {}]   ;;  %s3189_s8 = inlined_call_operand.vmem [shape: f32[2,1,96], index: 8, kind: input, shape index: {}]   ;;  %s3190_s9 = inlined_call_operand.vmem [shape: f32[2,32,32], index: 9, kind: input, shape index: {}]   ;;  %s3191_s10 = inlined_call_operand.vmem [shape: f32[2,1,32], index: 10, kind: input, shape index: {}]   ;;  %s3192_s11 = inlined_call_operand.vmem [shape: f32[2,1,32], index: 11, kind: input, shape index: {}]   ;;  %s3193_s12 = inlined_call_operand.vmem [shape: f32[2,1,32], index: 12, kind: input, shape index: {}]   ;;  %s3194_s13 = inlined_call_operand.vmem [shape: f32[2,32,64], index: 13, kind: input, shape index: {}]   ;;  %s3195_s14 = inlined_call_operand.vmem [shape: f32[2,1,64], index: 14, kind: input, shape index: {}]   ;;  %s3196_s15 = inlined_call_operand.vmem [shape: f32[2,64,32], index: 15, kind: input, shape index: {}]   ;;  %s3197_s16 = inlined_call_operand.vmem [shape: f32[2,1,32], index: 16, kind: input, shape index: {}]   ;;  %s3198_s17 = inlined_call_operand.vmem [shape: f32[1,32], index: 17, kind: input, shape index: {}]   ;;  %s3199_s18 = inlined_call_operand.vmem [shape: f32[1,32], index: 18, kind: input, shape index: {}]   ;;  %s3200_s19 = inlined_call_operand.vmem [shape: f32[32,128], index: 19, kind: input, shape index: {}]   ;;  %s3201_s20 = inlined_call_operand.vmem [shape: f32[1,128], index: 20, kind: input, shape index: {}]   ;;  %s3202_s21 = inlined_call_operand.vmem [shape: f32[2,8,128], index: 21, kind: output, shape index: {}]  }
   0x1   :  { %3215 = sst [smem:[#allocation5_spill]] %s3181_s0 }
   0x2   :  { %3216 = sst [smem:[#allocation6_spill]] %s3182_s1 }
   0x3   :  { %3217 = sst [smem:[#allocation7_spill]] %s3183_s2  ;;  %s2497_s2 = smov 0  }
   0x4   :  { %3218 = sst [smem:[#allocation8_spill]] %s3184_s3 }
   0x5   :  { %3219 = sst [smem:[#allocation9_spill]] %s3185_s4 }
   0x6   :  { %3220 = sst [smem:[#allocation10_spill]] %s3186_s5 }
   0x7 LB: > { %3221 = sst [smem:[#allocation4_spill]] %s2371_s2  ;;  %s2196_s25 = sadd.s32 4294967295, %s2371_s2   ;;  %s2371_s2 = sphi %s2497_s2, %s31_s2  }
   0x8   : > { %p2200_p0 = scmp.ge.s32.totalorder %s2371_s2, 1  ;;  %p587_p1 = scmp.lt.s32.totalorder %s2371_s2, 3 }
   0xa   : > { %p588_p2 = pnand %p2200_p0, %p587_p1 }
   0xb   : > { %s3222_s3 = sld [smem:[#allocation6_spill]] (!%p588_p2)  ;;  %p2582_p3 = scmp.lt.s32.totalorder (!%p588_p2), %s2196_s25, 1 }
   0xc   : > { %591 = sbr.rel (%p588_p2) target bundleno = 5208 (0x1458), region = 104  ;;  %s3224_s22 = sld [smem:[#allocation5_spill]] (!%p588_p2) }
   0xd   : > { %s3225_s0 = sld [smem:[#allocation8_spill]] (!%p588_p2)  ;;  %s2377_s4 = smov (!%p588_p2), 88  }
   0xe   : > { %s3226_s5 = sld [smem:[#allocation9_spill]] (!%p588_p2)  ;;  %s3207_s30 = smov (!%p588_p2), 56  }
   0xf   : > { %s3227_s1 = sld [smem:[#allocation7_spill]] (!%p588_p2)  ;;  %s3208_s2 = smov (!%p588_p2), 104  }
  0x10   : > { %s3228_s24 = sld [smem:[#allocation10_spill]] (!%p588_p2)  ;;  %s3211_s27 = smov (!%p588_p2), 80  }
  0x11   : > { %v677_v0 = vld [vmem:[%s3222_s3 + $0x78] sm:$0xff]  ;;  %v676_v1 = vld [vmem:[%s3222_s3 + $0x70] sm:$0xff]  ;;  %v675_v4 = vld [vmem:[%s3222_s3 + $0x68] sm:$0xff]  ;;  %s3239_s25 = smov (!%p2582_p3, %s2196_s25), 1  ;;  %vm905_vm0 = vcmask 253952   ;;  %vm911_vm1 = vcmask 256000  }
  0x12   : > { %v693_v2 = vld [vmem:[%s3222_s3 + $0xf8] sm:$0xff]  ;;  %782 = vmatpush.msra.mxu0 %v677_v0  ;;  %v692_v3 = vld [vmem:[%s3222_s3 + $0xf0] sm:$0xff]  ;;  %v691_v5 = vld [vmem:[%s3222_s3 + $0xe8] sm:$0xff]  ;;  %s2274_s26 = smul.u32 24, %s3239_s25  ;;  %vm909_vm2 = vcmask 257024   ;;  %vm916_vm3 = vcmask 261120  }
  0x13   : > { %802 = vmatpush.msra.mxu1 %v693_v2  ;;  %v674_v6 = vld [vmem:[%s3222_s3 + $0x60] sm:$0xff]  ;;  %v673_v8 = vld [vmem:[%s3222_s3 + $0x58] sm:$0xff]  ;;  %v672_v10 = vld [vmem:[%s3222_s3 + $0x50] sm:$0xff]  ;;  %vm985_vm8 = vcmask 785408   ;;  %vm995_vm9 = vcmask 64512   ;;  %s3232_s28 = smov 80  }
  0x14   : > { %783 = vmatpush.msra.mxu0 %v676_v1  ;;  %v690_v7 = vld [vmem:[%s3222_s3 + $0xe0] sm:$0xff]  ;;  %v689_v9 = vld [vmem:[%s3222_s3 + $0xd8] sm:$0xff]  ;;  %v688_v12 = vld [vmem:[%s3222_s3 + $0xd0] sm:$0xff]  ;;  %s2668_s23 = scalar_lea.vmem %s3224_s22, %s2274_s26  ;;  %s3213_s26 = smov 120  }
  0x15   : > { %803 = vmatpush.msra.mxu1 %v692_v3  ;;  %v709_v11 = vld [vmem:[%s3222_s3 + $0x178] sm:$0xff]  ;;  %v708_v13 = vld [vmem:[%s3222_s3 + $0x170] sm:$0xff]  ;;  %v707_v15 = vld [vmem:[%s3222_s3 + $0x168] sm:$0xff]  ;;  %s3214_s22 = smov 64  }
  0x16   : > { %784 = vmatpush.msra.mxu0 %v675_v4  ;;  %822 = vmatpush.msra.mxu2 %v709_v11  ;;  %v725_v14 = vld [vmem:[%s3222_s3 + $0x1f8] sm:$0xff]  ;;  %v724_v16 = vld [vmem:[%s3222_s3 + $0x1f0] sm:$0xff]  ;;  %v671_v17 = vld [vmem:[%s3222_s3 + $0x48] sm:$0xff] }
  0x17   : > { %804 = vmatpush.msra.mxu1 %v691_v5  ;;  %v687_v18 = vld [vmem:[%s3222_s3 + $0xc8] sm:$0xff]  ;;  %842 = vmatpush.msra.mxu3 %v725_v14  ;;  %v706_v19 = vld [vmem:[%s3222_s3 + $0x160] sm:$0xff]  ;;  %v705_v23 = vld [vmem:[%s3222_s3 + $0x158] sm:$0xff] }
  0x18   : > { %785 = vmatpush.msra.mxu0 %v674_v6  ;;  %823 = vmatpush.msra.mxu2 %v708_v13  ;;  %v723_v20 = vld [vmem:[%s3222_s3 + $0x1e8] sm:$0xff]  ;;  %v670_v21 = vld [vmem:[%s3222_s3 + $0x40] sm:$0xff]  ;;  %v669_v25 = vld [vmem:[%s3222_s3 + $0x38] sm:$0xff] }
  0x19   : > { %805 = vmatpush.msra.mxu1 %v690_v7  ;;  %v686_v22 = vld [vmem:[%s3222_s3 + $0xc0] sm:$0xff]  ;;  %843 = vmatpush.msra.mxu3 %v724_v16  ;;  %v685_v26 = vld [vmem:[%s3222_s3 + $0xb8] sm:$0xff]  ;;  %v704_v27 = vld [vmem:[%s3222_s3 + $0x150] sm:$0xff] }
  0x1a   : > { %786 = vmatpush.msra.mxu0 %v673_v8  ;;  %824 = vmatpush.msra.mxu2 %v707_v15  ;;  %v722_v24 = vld [vmem:[%s3222_s3 + $0x1e0] sm:$0xff]  ;;  %v721_v28 = vld [vmem:[%s3222_s3 + $0x1d8] sm:$0xff]  ;;  %v668_v29 = vld [vmem:[%s3222_s3 + $0x30] sm:$0xff] }
  0x1b   : > { %806 = vmatpush.msra.mxu1 %v689_v9  ;;  %844 = vmatpush.msra.mxu3 %v723_v20  ;;  %v684_v30 = vld [vmem:[%s3222_s3 + $0xb0] sm:$0xff]  ;;  %v703_v31 = vld [vmem:[%s3222_s3 + $0x148] sm:$0xff]  ;;  %v702_v35 = vld [vmem:[%s3222_s3 + $0x140] sm:$0xff] }
  0x1c   : > { %787 = vmatpush.msra.mxu0 %v672_v10  ;;  %825 = vmatpush.msra.mxu2 %v706_v19  ;;  %v720_v32 = vld [vmem:[%s3222_s3 + $0x1d0] sm:$0xff]  ;;  %v667_v33 = vld [vmem:[%s3222_s3 + $0x28] sm:$0xff]  ;;  %v666_v37 = vld [vmem:[%s3222_s3 + $0x20] sm:$0xff] }
  0x1d   : > { %807 = vmatpush.msra.mxu1 %v688_v12  ;;  %845 = vmatpush.msra.mxu3 %v722_v24  ;;  %v683_v34 = vld [vmem:[%s3222_s3 + $0xa8] sm:$0xff]  ;;  %v682_v38 = vld [vmem:[%s3222_s3 + $0xa0] sm:$0xff]  ;;  %v701_v39 = vld [vmem:[%s3222_s3 + $0x138] sm:$0xff] }
  0x1e   : > { %788 = vmatpush.msra.mxu0 %v671_v17  ;;  %826 = vmatpush.msra.mxu2 %v705_v23  ;;  %v719_v36 = vld [vmem:[%s3222_s3 + $0x1c8] sm:$0xff]  ;;  %v718_v40 = vld [vmem:[%s3222_s3 + $0x1c0] sm:$0xff]  ;;  %v665_v41 = vld [vmem:[%s3222_s3 + $0x18] sm:$0xff] }
  0x1f   : > { %808 = vmatpush.msra.mxu1 %v687_v18  ;;  %846 = vmatpush.msra.mxu3 %v721_v28  ;;  %v681_v42 = vld [vmem:[%s3222_s3 + $0x98] sm:$0xff]  ;;  %v700_v43 = vld [vmem:[%s3222_s3 + $0x130] sm:$0xff]  ;;  %v699_v47 = vld [vmem:[%s3222_s3 + $0x128] sm:$0xff] }
  0x20   : > { %789 = vmatpush.msra.mxu0 %v670_v21  ;;  %827 = vmatpush.msra.mxu2 %v704_v27  ;;  %v717_v44 = vld [vmem:[%s3222_s3 + $0x1b8] sm:$0xff]  ;;  %v664_v45 = vld [vmem:[%s3222_s3 + $0x10] sm:$0xff]  ;;  %v663_v49 = vld [vmem:[%s3222_s3 + $0x8] sm:$0xff] }
  0x21   : > { %809 = vmatpush.msra.mxu1 %v686_v22  ;;  %847 = vmatpush.msra.mxu3 %v720_v32  ;;  %v680_v46 = vld [vmem:[%s3222_s3 + $0x90] sm:$0xff]  ;;  %v679_v50 = vld [vmem:[%s3222_s3 + $0x88] sm:$0xff]  ;;  %v698_v51 = vld [vmem:[%s3222_s3 + $0x120] sm:$0xff] }
  0x22   : > { %790 = vmatpush.msra.mxu0 %v669_v25  ;;  %828 = vmatpush.msra.mxu2 %v703_v31  ;;  %v716_v48 = vld [vmem:[%s3222_s3 + $0x1b0] sm:$0xff]  ;;  %v715_v52 = vld [vmem:[%s3222_s3 + $0x1a8] sm:$0xff]  ;;  %v662_v53 = vld [vmem:[%s3222_s3] sm:$0xff] }
  0x23   : > { %810 = vmatpush.msra.mxu1 %v685_v26  ;;  %848 = vmatpush.msra.mxu3 %v719_v36  ;;  %v678_v54 = vld [vmem:[%s3222_s3 + $0x80] sm:$0xff]  ;;  %v660_v55 = vld [vmem:[%s2668_s23 + $0x8] sm:$0xff]  ;;  %v741_v56 = vld [vmem:[%s3222_s3 + $0x278] sm:$0xff] }
  0x24   : > { %791 = vmatpush.msra.mxu0 %v668_v29  ;;  %829 = vmatpush.msra.mxu2 %v702_v35  ;;  %v757_v57 = vld [vmem:[%s3222_s3 + $0x2f8] sm:$0xff]  ;;  %767 = vst [vmem:[#allocation1 + $0x10] ss:$2 sm:$0xff] %v660_v55  ;;  %v659_v58 = vld [vmem:[%s2668_s23] sm:$0xff]  ;;  %v740_v59 = vld [vmem:[%s3222_s3 + $0x270] sm:$0xff] }
  0x25   : > { %811 = vmatpush.msra.mxu1 %v684_v30  ;;  %849 = vmatpush.msra.mxu3 %v718_v40  ;;  %v697_v60 = vld [vmem:[%s3222_s3 + $0x118] sm:$0xff]  ;;  %v714_v61 = vld [vmem:[%s3222_s3 + $0x1a0] sm:$0xff]  ;;  %765 = vst [vmem:[#allocation1] ss:$2 sm:$0xff] %v659_v58  ;;  %v739_v62 = vld [vmem:[%s3222_s3 + $0x268] sm:$0xff] }
  0x26   : > { %792 = vmatpush.msra.mxu0 %v667_v33  ;;  %830 = vmatpush.msra.mxu2 %v701_v39  ;;  %v756_v63 = vld [vmem:[%s3222_s3 + $0x2f0] sm:$0xff]  ;;  %v755_v0 = vld [vmem:[%s3222_s3 + $0x2e8] sm:$0xff]  ;;  %v713_v2 = vld [vmem:[%s3222_s3 + $0x198] sm:$0xff] }
  0x27   : > { %812 = vmatpush.msra.mxu1 %v683_v34  ;;  %850 = vmatpush.msra.mxu3 %v717_v44  ;;  %v696_v1 = vld [vmem:[%s3222_s3 + $0x110] sm:$0xff]  ;;  %v738_v4 = vld [vmem:[%s3222_s3 + $0x260] sm:$0xff]  ;;  %v695_v6 = vld [vmem:[%s3222_s3 + $0x108] sm:$0xff]  ;;  %v2373_v44 = vmov 0.0  }
  0x28   : > { %793 = vmatpush.msra.mxu0 %v666_v37  ;;  %831 = vmatpush.msra.mxu2 %v700_v43  ;;  %v661_v3 = vld [vmem:[%s2668_s23 + $0x10] sm:$0xff]  ;;  %v754_v5 = vld [vmem:[%s3222_s3 + $0x2e0] sm:$0xff]  ;;  %v737_v8 = vld [vmem:[%s3222_s3 + $0x258] sm:$0xff]  ;;  %912 = vst.msk [vmem:[#allocation2 + $0x5] sm:$0x7] %vm911_vm1, %v2373_v44  ;;  %s2384_s23 = smov 112  }
  0x29   : > { %813 = vmatpush.msra.mxu1 %v682_v38  ;;  %851 = vmatpush.msra.mxu3 %v716_v48  ;;  %v712_v7 = vld [vmem:[%s3222_s3 + $0x190] sm:$0xff]  ;;  %769 = vst [vmem:[#allocation1 + $0x20] ss:$2 sm:$0xff] %v661_v3  ;;  %v753_v9 = vld [vmem:[%s3222_s3 + $0x2d8] sm:$0xff]  ;;  %v694_v10 = vld [vmem:[%s3222_s3 + $0x100] sm:$0xff] }
  0x2a   : > { %794 = vmatpush.msra.mxu0 %v665_v41  ;;  %832 = vmatpush.msra.mxu2 %v699_v47  ;;  %v711_v11 = vld [vmem:[%s3222_s3 + $0x188] sm:$0xff]  ;;  %v736_v12 = vld [vmem:[%s3222_s3 + $0x250] sm:$0xff]  ;;  %v710_v15 = vld [vmem:[%s3222_s3 + $0x180] sm:$0xff] }
  0x2b   : > { %814 = vmatpush.msra.mxu1 %v681_v42  ;;  %852 = vmatpush.msra.mxu3 %v715_v52  ;;  %v752_v13 = vld [vmem:[%s3222_s3 + $0x2d0] sm:$0xff]  ;;  %v773_v16 = vld.sshfl [vmem:[#allocation1 + $0x18] sm:$0xff pattern:$0x75316420]  ;;  %v735_v17 = vld [vmem:[%s3222_s3 + $0x248] sm:$0xff] }
  0x2c   : > { %795 = vmatpush.msra.mxu0 %v664_v45  ;;  %833 = vmatpush.msra.mxu2 %v698_v51  ;;  %v772_v14 = vld.sshfl [vmem:[#allocation1 + $0x10] sm:$0xff pattern:$0x75316420]  ;;  %v751_v18 = vld [vmem:[%s3222_s3 + $0x2c8] sm:$0xff]  ;;  %v734_v21 = vld [vmem:[%s3222_s3 + $0x240] sm:$0xff] }
  0x2d   : > { %815 = vmatpush.msra.mxu1 %v680_v46  ;;  %853 = vmatpush.msra.mxu3 %v714_v61  ;;  %v770_v19 = vld.sshfl [vmem:[#allocation1] sm:$0xff pattern:$0x75316420]  ;;  %v771_v20 = vld.sshfl [vmem:[#allocation1 + $0x8] sm:$0xff pattern:$0x75316420] }
  0x2e   : > { %796 = vmatpush.msra.mxu0 %v663_v49  ;;  %834 = vmatpush.msra.mxu2 %v697_v60  ;;  %v750_v22 = vld [vmem:[%s3222_s3 + $0x2c0] sm:$0xff]  ;;  %v733_v23 = vld [vmem:[%s3222_s3 + $0x238] sm:$0xff]  ;;  %v732_v25 = vld [vmem:[%s3222_s3 + $0x230] sm:$0xff] }
  0x2f   : > { %816 = vmatpush.msra.mxu1 %v679_v50  ;;  %854 = vmatpush.msra.mxu3 %v713_v2  ;;  %v749_v24 = vld [vmem:[%s3222_s3 + $0x2b8] sm:$0xff]  ;;  %v748_v26 = vld [vmem:[%s3222_s3 + $0x2b0] sm:$0xff]  ;;  %v731_v27 = vld [vmem:[%s3222_s3 + $0x228] sm:$0xff] }
  0x30   : > { %797 = vmatpush.msra.mxu0 %v662_v53  ;;  %835 = vmatpush.msra.mxu2 %v696_v1  ;;  %v747_v28 = vld [vmem:[%s3222_s3 + $0x2a8] sm:$0xff]  ;;  %v730_v29 = vld [vmem:[%s3222_s3 + $0x220] sm:$0xff]  ;;  %v729_v31 = vld [vmem:[%s3222_s3 + $0x218] sm:$0xff] }
  0x31   : > { %817 = vmatpush.msra.mxu1 %v678_v54  ;;  %855 = vmatpush.msra.mxu3 %v712_v7  ;;  %v746_v30 = vld [vmem:[%s3222_s3 + $0x2a0] sm:$0xff]  ;;  %v745_v32 = vld [vmem:[%s3222_s3 + $0x298] sm:$0xff]  ;;  %v728_v33 = vld [vmem:[%s3222_s3 + $0x210] sm:$0xff] }
  0x32   : > { %862 = vmatpush.msrb.mxu0 %v741_v56  ;;  %836 = vmatpush.msra.mxu2 %v695_v6  ;;  %v744_v34 = vld [vmem:[%s3222_s3 + $0x290] sm:$0xff]  ;;  %v727_v35 = vld [vmem:[%s3222_s3 + $0x208] sm:$0xff]  ;;  %v726_v37 = vld [vmem:[%s3222_s3 + $0x200] sm:$0xff] }
  0x33   : > { %882 = vmatpush.msrb.mxu1 %v757_v57  ;;  %856 = vmatpush.msra.mxu3 %v711_v11  ;;  %v743_v36 = vld [vmem:[%s3222_s3 + $0x288] sm:$0xff]  ;;  %v742_v38 = vld [vmem:[%s3222_s3 + $0x280] sm:$0xff]  ;;  %v956_v11 = vld [vmem:[%s3188_s7 + $0x10] sm:$0xff] }
  0x34   : > { %863 = vmatpush.msrb.mxu0 %v740_v59  ;;  %837 = vmatpush.msra.mxu2 %v694_v10  ;;  %v774_v39 = vld.sshfl [vmem:[#allocation1 + $0x20] sm:$0xff pattern:$0x75316420]  ;;  %v775_v40 = vld.sshfl [vmem:[#allocation1 + $0x28] sm:$0xff pattern:$0x75316420] }
  0x35   : > { %883 = vmatpush.msrb.mxu1 %v756_v63  ;;  %838 = vmatmul.f32.vlgmr.msra.gmra.mxu2 %v772_v14  ;;  %v902_v41 = vld [vmem:[%s3225_s0] sm:$0x1]  ;;  %v907_v57 = vld [vmem:[%s3226_s5 + $0x1] sm:$0xf]  ;;  %v957_v10 = vld [vmem:[%s3188_s7 + $0x18] sm:$0xff]  ;;  %s2376_s0 = smov 96  }
  0x36   : > { %864 = vmatpush.msrb.mxu0 %v739_v62  ;;  %857 = vmatpush.msra.mxu3 %v710_v15  ;;  %v903_v42 = vld [vmem:[%s3226_s5] sm:$0x1]  ;;  %v2374_v62 = vmov 32.0  }
  0x37   : > { %884 = vmatpush.msrb.mxu1 %v755_v0  ;;  %798 = vmatmul.f32.vlgmr.msra.gmra.mxu0 %v770_v19  ;;  %v904_v43 = vadd.f32 %v903_v42, %v902_v41  ;;  %v2297_v45 = vld [vmem:[%s3227_s1] ss:$0 sm:$0xff]  ;;  %2317 = vrcp.f32 %v2374_v62  ;;  %s3212_s1 = smov 72  }
  0x38   : > { %865 = vmatpush.msrb.mxu0 %v738_v4  ;;  %858 = vmatmul.f32.vlgmr.msra.gmra.mxu3 %v773_v16 }
  0x39   : > { %885 = vmatpush.msrb.mxu1 %v754_v5  ;;  %906 = vst.msk [vmem:[#allocation2] sm:$0x1] %vm905_vm0, %v904_v43  ;;  %977 = vmatpush.msrb.mxu2 %v957_v10 }
  0x3a   : > { %866 = vmatpush.msrb.mxu0 %v737_v8  ;;  %818 = vmatmul.f32.vlgmr.msra.gmra.mxu1 %v771_v20 }
  0x3b   : > { %886 = vmatpush.msrb.mxu1 %v753_v9  ;;  %978 = vmatpush.msrb.mxu2 %v956_v11 }
  0x3c   : > { %867 = vmatpush.msrb.mxu0 %v736_v12  ;;  %v955_v12 = vld [vmem:[%s3188_s7 + $0x8] sm:$0xff] }
  0x3d   : > { %887 = vmatpush.msrb.mxu1 %v752_v13  ;;  %v2318_v63 = vpop.eup %2317  ;;  %v954_v13 = vld [vmem:[%s3188_s7] sm:$0xff]  ;;  %979 = vmatpush.msrb.mxu2 %v955_v12 }
  0x3e   : > { %868 = vmatpush.msrb.mxu0 %v735_v17  ;;  %v921_v0 = vmul.f32 32.0, %v2318_v63  ;;  %vm925_vm4 = vweird.f32 %v2318_v63 }
  0x3f   : > { %888 = vmatpush.msrb.mxu1 %v751_v18  ;;  %980 = vmatpush.msrb.mxu2 %v954_v13 }
  0x40   : > { %869 = vmatpush.msrb.mxu0 %v734_v21  ;;  %v922_v1 = vsub.f32 1.0, %v921_v0 }
  0x41   : > { %889 = vmatpush.msrb.mxu1 %v750_v22 }
  0x42   : > { %870 = vmatpush.msrb.mxu0 %v733_v23  ;;  %v923_v2 = vmul.f32 %v2318_v63, %v922_v1  ;;  %v2298_v23 = vld [vmem:[%s3228_s24] ss:$0 sm:$0xff] }
  0x43   : > { %890 = vmatpush.msrb.mxu1 %v749_v24 }
  0x44   : > { %871 = vmatpush.msrb.mxu0 %v732_v25  ;;  %v924_v3 = vadd.f32 %v2318_v63, %v923_v2 }
  0x45   : > { %891 = vmatpush.msrb.mxu1 %v748_v26  ;;  %v2299_v26 = vld [vmem:[%s3187_s6] ss:$0 sm:$0xff] }
  0x46   : > { %872 = vmatpush.msrb.mxu0 %v731_v27  ;;  %v2830_v4 = vsel %vm925_vm4, %v2318_v63, %v924_v3  ;;  %v987_v63 = vld [vmem:[%s3190_s9] sm:$0xff] }
  0x47   : > { %892 = vmatpush.msrb.mxu1 %v747_v28 }
  0x48   : > { %873 = vmatpush.msrb.mxu0 %v730_v29  ;;  %v2300_v29 = vld [vmem:[%s3189_s8] ss:$0 sm:$0xff] }
  0x49   : > { %893 = vmatpush.msrb.mxu1 %v746_v30 }
  0x4a   : > { %874 = vmatpush.msrb.mxu0 %v729_v31 }
  0x4b   : > { %894 = vmatpush.msrb.mxu1 %v745_v32 }
  0x4c   : > { %875 = vmatpush.msrb.mxu0 %v728_v33 }
  0x4d   : > { %895 = vmatpush.msrb.mxu1 %v744_v34 }
  0x4e   : > { %876 = vmatpush.msrb.mxu0 %v727_v35 }
  0x4f   : > { %896 = vmatpush.msrb.mxu1 %v743_v36  ;;  %v655_v36 = vlaneseq }
  0x50   : > { %877 = vmatpush.msrb.mxu0 %v726_v37 }
  0x51   : > { %897 = vmatpush.msrb.mxu1 %v742_v38  ;;  %878 = vmatmul.f32.vlgmr.msrb.gmra.mxu0 %v774_v39  ;;  %v656_v37 = vand.u32 127, %v655_v36  ;;  %v2378_v38 = vmov -1e+30  }
  0x52   : > { %898 = vmatmul.f32.vlgmr.msrb.gmra.mxu1 %v775_v40 }
  0x53   : > { %vm657_vm10 = vcmp.lt.s32.totalorder %v656_v37, 5 }
  0x54   : > { %v2872_v39 = vsel %vm657_vm10, 0.0, %v2378_v38  ;;  %v990_v38 = vld [vmem:[%s3190_s9 + $0x18] sm:$0xff] }
  0xb4   : > { %v799_v46 = vpop.f32.mrf.mxu0 }
  0xb5   : > { %v800_v47 = vadd.f32 %v2297_v45, %v799_v46 }
  0xb7   : > { %v819_v48 = vpop.f32.mrf.mxu1 }
  0xb8   : > { %v820_v49 = vadd.f32 %v819_v48, %v800_v47  ;;  %v839_v50 = vpop.f32.mrf.mxu2 }
  0xba   : > { %v840_v51 = vadd.f32 %v839_v50, %v820_v49 }
  0xbb   : > { %v859_v52 = vpop.f32.mrf.mxu3 }
  0xbc   : > { %v860_v53 = vadd.f32 %v859_v52, %v840_v51 }
  0xce   : > { %v879_v54 = vpop.f32.mrf.mxu0 }
  0xcf   : > { %v899_v55 = vpop.f32.mrf.mxu1  ;;  %v880_v56 = vadd.f32 %v879_v54, %v860_v53 }
  0xd1   : > { %v900_v58 = vadd.f32 %v899_v55, %v880_v56  ;;  %v988_v56 = vld [vmem:[%s3190_s9 + $0x8] sm:$0xff] }
  0xd3   : > { %v908_v59 = vadd.f32 %v907_v57, %v900_v58 }
  0xd5   : > { %910 = vst.msk [vmem:[#allocation2 + $0x1] sm:$0xf] %vm909_vm2, %v908_v59  ;;  %vm1471_vm2 = vcmask 523264  }
  0xdc   : > { %v2826_v60 = vld [vmem:[#allocation2] sm:$0xff] }
  0xdd   : > { %v917_v61 = vsel %vm916_vm3, %v2826_v60, 0.0 }
  0xde   : > { %918 = vadd.xlane.f32.xlu0 %v917_v61 }
 0x151   : > { %v919_v5 = vpop.xlane.xlu0 %918 }
 0x152   : > { %v927_v6 = vmul.f32 %v2830_v4, %v919_v5 }
 0x154   : > { %v928_v7 = vsub.f32 %v2826_v60, %v927_v6 }
 0x156   : > { %v929_v8 = vmul.f32 %v928_v7, %v928_v7 }
 0x158   : > { %v930_v9 = vsel %vm916_vm3, %v929_v8, 0.0 }
 0x159   : > { %931 = vadd.xlane.f32.xlu0 %v930_v9 }
 0x1cc   : > { %v932_v14 = vpop.xlane.xlu0 %931 }
 0x1cd   : > { %v933_v15 = vmul.f32 %v932_v14, %v2830_v4 }
 0x1cf   : > { %v934_v16 = vadd.f32 1e-12, %v933_v15 }
 0x1d1   : > { %2319 = vrsqrt.f32 %v934_v16  ;;  %vm941_vm6 = vweird.f32 %v934_v16 }
 0x1d7   : > { %v2320_v17 = vpop.eup %2319 }
 0x1d8   : > { %v936_v18 = vmul.f32 %v2320_v17, %v934_v16  ;;  %vm942_vm5 = vweird.f32 %v2320_v17 }
 0x1d9   : > { %vm943_vm7 = vmor %vm941_vm6, %vm942_vm5 }
 0x1da   : > { %v937_v19 = vmul.f32 %v2320_v17, %v936_v18 }
 0x1dc   : > { %v938_v20 = vmul.f32 0.5, %v937_v19 }
 0x1de   : > { %v939_v21 = vsub.f32 1.5, %v938_v20 }
 0x1e0   : > { %v940_v22 = vmul.f32 %v2320_v17, %v939_v21 }
 0x1e2   : > { %v944_v24 = vsel %vm943_vm7, %v2320_v17, %v940_v22 }
 0x1e3   : > { %v945_v25 = vmul.f32 %v944_v24, %v928_v7 }
 0x1e5   : > { %v949_v27 = vmul.f32 %v2298_v23, %v945_v25 }
 0x1e7   : > { %v953_v28 = vadd.f32 %v2299_v26, %v949_v27 }
 0x1e9   : > { %2203 = vmatmul.msk.f32.vlgmr.msrb.gmra.mxu2 %vm916_vm3, %v953_v28 }
 0x26c   : > { %v982_v30 = vpop.f32.mrf.mxu2 }
 0x26d   : > { %v983_v31 = vadd.f32 %v2300_v29, %v982_v30 }
 0x26f   : > { %986 = vst.msk [vmem:[#allocation3] sm:$0xff] %vm985_vm8, %v983_v31 }
 0x276   : > { %v2859_v32 = vld [vmem:[#allocation3] sm:$0xff] }
 0x277   : > { %1057 = vrot.lane.b32.xlu2 %v2859_v32, %s3213_s26  ;;  %993 = vrot.lane.b32.xlu1 %v2859_v32, %s2376_s0  ;;  %s3234_s26 = smov 40  }
 0x27f   : > { %1059 = vrot.lane.b32.xlu1 %v2859_v32, %s2377_s4 }
 0x2d1   : > { %v1058_v35 = vpop.permute.xlu2 %1057 }
 0x2e9   : > { %v994_v33 = vpop.permute.xlu1 %993 }
 0x2ea   : > { %2204 = vmatpush.xpose.msk.msrb.mxu3 %vm995_vm9, %v994_v33 }
 0x2ed   : > { %2205 = vmatmul.msk.f32.vlgmr.msrb.gmra.mxu3 %vm995_vm9, %v2859_v32 }
 0x2f1   : > { %v1060_v34 = vpop.permute.xlu1 %1059 }
 0x2f2   : > { %2207 = vmatpush.xpose.msk.msra.mxu3 %vm995_vm9, %v1060_v34 }
 0x2f5   : > { %2208 = vmatmul.msk.f32.vlgmr.msra.gmra.mxu3 %vm995_vm9, %v1058_v35 }
 0x2f6   : > { %1140 = vmatpush.msrb.mxu3 %v988_v56  ;;  %v1385_v56 = vld [vmem:[%s3194_s13 + $0x8] sm:$0xff] }
 0x370   : > { %v1017_v40 = vpop.f32.mrf.mxu3 }
 0x371   : > { %v1018_v41 = vadd.f32 %v1017_v40, %v2872_v39 }
 0x373   : > { %v1020_v42 = vsel %vm995_vm9, %v1018_v41, -inf }
 0x374   : > { %1021 = vmax.xlane.f32.xlu2 %v1020_v42 }
 0x378   : > { %v1082_v43 = vpop.f32.mrf.mxu3 }
 0x379   : > { %v1083_v44 = vadd.f32 %v1082_v43, %v2872_v39 }
 0x37b   : > { %v1085_v45 = vsel %vm995_vm9, %v1083_v44, -inf }
 0x37c   : > { %1086 = vmax.xlane.f32.xlu0 %v1085_v45 }
 0x38c   : > { %1096 = vrot.lane.b32.xlu2 %v2859_v32, %s3207_s30  ;;  %s3210_s30 = smov 40  }
 0x3e7   : > { %v1022_v46 = vpop.xlane.xlu2 %1021 }
 0x3e8   : > { %v1023_v47 = vsub.f32 %v1018_v41, %v1022_v46  ;;  %v2301_v46 = vld [vmem:[%s3191_s10] ss:$0 sm:$0xff] }
 0x3ea   : > { %v1024_v48 = vmul.f32 1.442695, %v1023_v47 }
 0x3ec   : > { %2321 = vpow2.f32 %v1024_v48 }
 0x3ef   : > { %v1087_v49 = vpop.xlane.xlu0 %1086  ;;  %v1097_v0 = vpop.permute.xlu2 %1096 }
 0x3f0   : > { %v1088_v50 = vsub.f32 %v1083_v44, %v1087_v49 }
 0x3f2   : > { %v2322_v51 = vpop.eup %2321  ;;  %v1089_v52 = vmul.f32 1.442695, %v1088_v50 }
 0x3f3   : > { %v1026_v53 = vsel %vm995_vm9, %v2322_v51, 0.0 }
 0x3f4   : > { %2323 = vpow2.f32 %v1089_v52  ;;  %1027 = vadd.xlane.f32.xlu1 %v1026_v53 }
 0x3fa   : > { %v2324_v54 = vpop.eup %2323 }
 0x3fb   : > { %v1091_v55 = vsel %vm995_vm9, %v2324_v54, 0.0 }
 0x3fc   : > { %1092 = vadd.xlane.f32.xlu0 %v1091_v55  ;;  %v1387_v55 = vld [vmem:[%s3194_s13 + $0x18] sm:$0xff] }
 0x40d   : > { %1257 = vrot.lane.b32.xlu1 %v2859_v32, %s3208_s2  ;;  %s3209_s2 = smov 48  }
 0x410   : > { %1031 = vrot.lane.b32.xlu0 %v2859_v32, %s3214_s22  ;;  %s3235_s22 = smov 48  }
 0x418   : > { %1259 = vrot.lane.b32.xlu0 %v2859_v32, %s3212_s1  ;;  %s3233_s1 = smov 104  }
 0x420   : > { %1170 = vrot.lane.b32.xlu0 %v2859_v32, %s3211_s27  ;;  %s3236_s27 = smov 56  }
 0x428   : > { %1168 = vrot.lane.b32.xlu0 %v2859_v32, %s2384_s23 }
 0x467   : > { %v1028_v57 = vpop.xlane.xlu1 %1027 }
 0x468   : > { %2325 = vrcp.f32 %v1028_v57  ;;  %v1384_v57 = vld [vmem:[%s3194_s13] sm:$0xff] }
 0x46e   : > { %v2326_v59 = vpop.eup %2325 }
 0x46f   : > { %v1093_v58 = vpop.xlane.xlu0 %1092  ;;  %v1030_v61 = vmul.f32 %v2326_v59, %v2322_v51 }
 0x470   : > { %2327 = vrcp.f32 %v1093_v58 }
 0x476   : > { %v2328_v1 = vpop.eup %2327 }
 0x477   : > { %v1095_v2 = vmul.f32 %v2328_v1, %v2324_v54 }
 0x47f   : > { %v1258_v7 = vpop.permute.xlu1 %1257 }
 0x482   : > { %v1032_v62 = vpop.permute.xlu0 %1031 }
 0x483   : > { %1052 = vmatpush.msra.mxu2 %v1032_v62 }
 0x484   : > { %2206 = vmatmul.msk.f32.vlgmr.msra.gmra.mxu2 %vm995_vm9, %v1030_v61 }
 0x485   : > { %1117 = vmatpush.msrb.mxu2 %v1097_v0 }
 0x487   : > { %1163 = vmatpush.msra.mxu2 %v987_v63 }
 0x48a   : > { %v1260_v3 = vpop.permute.xlu0 %1259 }
 0x48c   : > { %2209 = vmatmul.msk.f32.vlgmr.msrb.gmra.mxu2 %vm995_vm9, %v1095_v2 }
 0x48d   : > { %2216 = vmatpush.xpose.msk.msrb.mxu2 %vm995_vm9, %v1260_v3 }
 0x492   : > { %v1171_v5 = vpop.permute.xlu0 %1170 }
 0x493   : > { %2212 = vmatpush.xpose.msk.msra.mxu3 %vm995_vm9, %v1171_v5  ;;  %v2302_v5 = vld [vmem:[%s3192_s11] ss:$0 sm:$0xff] }
 0x49a   : > { %v1169_v9 = vpop.permute.xlu0 %1168 }
 0x507   : > { %v1054_v6 = vpop.f32.mrf.mxu2 }
 0x508   : > { %2211 = vmatmul.msk.f32.vlgmr.msra.gmra.mxu2 %vm995_vm9, %v1054_v6 }
 0x50f   : > { %v1119_v8 = vpop.f32.mrf.mxu2 }
 0x510   : > { %2210 = vmatmul.msk.f32.vlgmr.msrb.gmra.mxu3 %vm995_vm9, %v1119_v8  ;;  %2217 = vmatmul.msk.f32.vlgmr.msrb.gmra.mxu2 %vm995_vm9, %v1258_v7  ;;  %v2303_v8 = vld [vmem:[%s3193_s12] ss:$0 sm:$0xff] }
 0x518   : > { %2213 = vmatmul.msk.f32.vlgmr.msra.gmra.mxu3 %vm995_vm9, %v1169_v9 }
 0x58b   : > { %v1165_v10 = vpop.f32.mrf.mxu2 }
 0x593   : > { %v1142_v11 = vpop.f32.mrf.mxu3  ;;  %v1282_v12 = vpop.f32.mrf.mxu2 }
 0x594   : > { %v1166_v13 = vadd.f32 %v1165_v10, %v1142_v11  ;;  %v1283_v14 = vadd.f32 %v1282_v12, %v2872_v39  ;;  %v2304_v11 = vld [vmem:[%s3195_s14] ss:$0 sm:$0xff] }
 0x596   : > { %v1285_v15 = vsel %vm995_vm9, %v1283_v14, -inf }
 0x597   : > { %1286 = vmax.xlane.f32.xlu2 %v1285_v15 }
 0x59b   : > { %v1193_v16 = vpop.f32.mrf.mxu3 }
 0x59c   : > { %v1194_v17 = vadd.f32 %v1193_v16, %v2872_v39 }
 0x59e   : > { %v1196_v18 = vsel %vm995_vm9, %v1194_v17, -inf }
 0x59f   : > { %1197 = vmax.xlane.f32.xlu0 %v1196_v18 }
 0x5b3   : > { %1296 = vrot.lane.b32.xlu0 %v2859_v32, %s3210_s30 }
 0x60a   : > { %v1287_v19 = vpop.xlane.xlu2 %1286 }
 0x60b   : > { %v1288_v20 = vsub.f32 %v1283_v14, %v1287_v19 }
 0x60d   : > { %v1289_v21 = vmul.f32 1.442695, %v1288_v20  ;;  %v1465_v20 = vld [vmem:[%s3196_s15 + $0x30] sm:$0xff] }
 0x60f   : > { %2329 = vpow2.f32 %v1289_v21 }
 0x612   : > { %v1198_v22 = vpop.xlane.xlu0 %1197 }
 0x613   : > { %v1199_v23 = vsub.f32 %v1194_v17, %v1198_v22  ;;  %v1466_v17 = vld [vmem:[%s3196_s15 + $0x38] sm:$0xff] }
 0x614   : > { %1483 = vmatpush.msra.mxu2 %v1466_v17 }
 0x615   : > { %v2330_v24 = vpop.eup %2329  ;;  %v1200_v25 = vmul.f32 1.442695, %v1199_v23  ;;  %v1464_v23 = vld [vmem:[%s3196_s15 + $0x28] sm:$0xff] }
 0x616   : > { %v1291_v26 = vsel %vm995_vm9, %v2330_v24, 0.0  ;;  %1484 = vmatpush.msra.mxu2 %v1465_v20 }
 0x617   : > { %2331 = vpow2.f32 %v1200_v25  ;;  %1292 = vadd.xlane.f32.xlu1 %v1291_v26  ;;  %v1463_v26 = vld [vmem:[%s3196_s15 + $0x20] sm:$0xff] }
 0x618   : > { %1485 = vmatpush.msra.mxu2 %v1464_v23 }
 0x61a   : > { %1486 = vmatpush.msra.mxu2 %v1463_v26 }
 0x61d   : > { %v2332_v27 = vpop.eup %2331 }
 0x61e   : > { %v1202_v28 = vsel %vm995_vm9, %v2332_v27, 0.0 }
 0x61f   : > { %1203 = vadd.xlane.f32.xlu2 %v1202_v28  ;;  %v1462_v28 = vld [vmem:[%s3196_s15 + $0x18] sm:$0xff] }
 0x620   : > { %1487 = vmatpush.msra.mxu2 %v1462_v28  ;;  %v2308_v28 = vld [vmem:[%s3189_s8 + $0x1] ss:$0 sm:$0xff] }
 0x625   : > { %v1297_v29 = vpop.permute.xlu0 %1296 }
 0x626   : > { %1317 = vmatpush.msrb.mxu3 %v1297_v29 }
 0x637   : > { %1207 = vrot.lane.b32.xlu2 %v2859_v32, %s3209_s2  ;;  %v989_v32 = vld [vmem:[%s3190_s9 + $0x10] sm:$0xff] }
 0x638   : > { %1251 = vmatpush.msra.mxu1 %v989_v32 }
 0x63a   : > { %1407 = vmatpush.msrb.mxu1 %v1387_v55 }
 0x68a   : > { %v1293_v30 = vpop.xlane.xlu1 %1292 }
 0x68b   : > { %2333 = vrcp.f32 %v1293_v30 }
 0x691   : > { %v2334_v31 = vpop.eup %2333 }
 0x692   : > { %v1295_v33 = vmul.f32 %v2334_v31, %v2330_v24  ;;  %v1204_v34 = vpop.xlane.xlu2 %1203  ;;  %v1461_v31 = vld [vmem:[%s3196_s15 + $0x10] sm:$0xff] }
 0x693   : > { %2335 = vrcp.f32 %v1204_v34  ;;  %1488 = vmatpush.msra.mxu2 %v1461_v31  ;;  %v1460_v34 = vld [vmem:[%s3196_s15 + $0x8] sm:$0xff] }
 0x694   : > { %2218 = vmatmul.msk.f32.vlgmr.msrb.gmra.mxu3 %vm995_vm9, %v1295_v33 }
 0x695   : > { %1489 = vmatpush.msra.mxu2 %v1460_v34 }
 0x699   : > { %v2336_v35 = vpop.eup %2335 }
 0x69a   : > { %v1206_v36 = vmul.f32 %v2336_v35, %v2332_v27  ;;  %v1208_v37 = vpop.permute.xlu2 %1207 }
 0x69b   : > { %1228 = vmatpush.msra.mxu0 %v1208_v37 }
 0x69c   : > { %2214 = vmatmul.msk.f32.vlgmr.msra.gmra.mxu0 %vm995_vm9, %v1206_v36  ;;  %v1459_v36 = vld [vmem:[%s3196_s15] sm:$0xff] }
 0x69d   : > { %1340 = vmatpush.msrb.mxu0 %v990_v38  ;;  %1490 = vmatpush.msra.mxu2 %v1459_v36 }
 0x717   : > { %v1319_v40 = vpop.f32.mrf.mxu3 }
 0x718   : > { %2219 = vmatmul.msk.f32.vlgmr.msrb.gmra.mxu0 %vm995_vm9, %v1319_v40 }
 0x719   : > { %v1230_v41 = vpop.f32.mrf.mxu0 }
 0x71a   : > { %2215 = vmatmul.msk.f32.vlgmr.msra.gmra.mxu1 %vm995_vm9, %v1230_v41 }
 0x795   : > { %v1342_v44 = vpop.f32.mrf.mxu0 }
 0x797   : > { %v1253_v42 = vpop.f32.mrf.mxu1 }
 0x798   : > { %v1256_v43 = vadd.f32 %v1253_v42, %v1166_v13 }
 0x79a   : > { %v1345_v45 = vadd.f32 %v1342_v44, %v1256_v43 }
 0x79c   : > { %v1346_v47 = vadd.f32 %v1345_v45, %v2826_v60  ;;  %v1386_v60 = vld [vmem:[%s3194_s13 + $0x10] sm:$0xff] }
 0x79d   : > { %1408 = vmatpush.msrb.mxu1 %v1386_v60 }
 0x79e   : > { %v2930_v48 = vadd.f32 %v2301_v46, %v1346_v47 }
 0x79f   : > { %1409 = vmatpush.msrb.mxu1 %v1385_v56 }
 0x7a0   : > { %v1354_v49 = vsel %vm916_vm3, %v2930_v48, 0.0 }
 0x7a1   : > { %1355 = vadd.xlane.f32.xlu1 %v1354_v49  ;;  %1410 = vmatpush.msrb.mxu1 %v1384_v57 }
 0x814   : > { %v1356_v50 = vpop.xlane.xlu1 %1355 }
 0x815   : > { %v1357_v51 = vmul.f32 %v1356_v50, %v2830_v4 }
 0x817   : > { %v1358_v52 = vsub.f32 %v2930_v48, %v1357_v51 }
 0x819   : > { %v1359_v53 = vmul.f32 %v1358_v52, %v1358_v52 }
 0x81b   : > { %v1360_v54 = vsel %vm916_vm3, %v1359_v53, 0.0 }
 0x81c   : > { %1361 = vadd.xlane.f32.xlu1 %v1360_v54 }
 0x88f   : > { %v1362_v58 = vpop.xlane.xlu1 %1361 }
 0x890   : > { %v1363_v59 = vmul.f32 %v1362_v58, %v2830_v4 }
 0x892   : > { %v1364_v61 = vadd.f32 1e-12, %v1363_v59 }
 0x894   : > { %2337 = vrsqrt.f32 %v1364_v61  ;;  %vm1371_vm12 = vweird.f32 %v1364_v61 }
 0x89a   : > { %v2338_v62 = vpop.eup %2337 }
 0x89b   : > { %v1366_v63 = vmul.f32 %v2338_v62, %v1364_v61  ;;  %vm1372_vm11 = vweird.f32 %v2338_v62 }
 0x89c   : > { %vm1373_vm13 = vmor %vm1371_vm12, %vm1372_vm11 }
 0x89d   : > { %v1367_v0 = vmul.f32 %v2338_v62, %v1366_v63  ;;  %v2305_v63 = vld [vmem:[%s3197_s16] ss:$0 sm:$0xff] }
 0x89f   : > { %v1368_v1 = vmul.f32 0.5, %v1367_v0 }
 0x8a1   : > { %v1369_v2 = vsub.f32 1.5, %v1368_v1 }
 0x8a3   : > { %v1370_v3 = vmul.f32 %v2338_v62, %v1369_v2 }
 0x8a5   : > { %v1374_v6 = vsel %vm1373_vm13, %v2338_v62, %v1370_v3 }
 0x8a6   : > { %v1375_v7 = vmul.f32 %v1374_v6, %v1358_v52 }
 0x8a8   : > { %v1379_v9 = vmul.f32 %v2302_v5, %v1375_v7 }
 0x8aa   : > { %v1383_v10 = vadd.f32 %v2303_v8, %v1379_v9 }
 0x8ac   : > { %2220 = vmatmul.msk.f32.vlgmr.msrb.gmra.mxu1 %vm916_vm3, %v1383_v10  ;;  %v2228_v10 = vld [vmem:[%s3188_s7 + $0x38] sm:$0xff] }
 0x8ad   : > { %1555 = vmatpush.msra.mxu3 %v2228_v10 }
 0x929   : > { %v1412_v12 = vpop.f32.mrf.mxu1 }
 0x92a   : > { %v1413_v13 = vadd.f32 %v2304_v11, %v1412_v12  ;;  %v2226_v11 = vld [vmem:[%s3188_s7 + $0x28] sm:$0xff]  ;;  %v2225_v12 = vld [vmem:[%s3188_s7 + $0x20] sm:$0xff] }
 0x92c   : > { %v1416_v14 = vmul.f32 0.70710677, %v1413_v13  ;;  %v1415_v59 = vmul.f32 0.5, %v1413_v13 }
 0x92e   : > { %v1417_v15 = vmul.f32 %v1416_v14, %v1416_v14 }
 0x930   : > { %v1418_v16 = vmin.f32 %v1417_v15, 16.0 }
 0x932   : > { %v1419_v18 = vmul.f32 2.1237322e-06, %v1418_v16  ;;  %v1430_v19 = vmul.f32 3.8918573e-05, %v1418_v16 }
 0x934   : > { %v1420_v21 = vadd.f32 0.00028619796, %v1419_v18  ;;  %v1431_v22 = vadd.f32 0.001143296, %v1430_v19 }
 0x936   : > { %v1421_v24 = vmul.f32 %v1420_v21, %v1418_v16  ;;  %v1432_v25 = vmul.f32 %v1431_v22, %v1418_v16  ;;  %v2306_v22 = vld [vmem:[%s3228_s24 + $0x1] ss:$0 sm:$0xff] }
 0x938   : > { %v1433_v27 = vadd.f32 0.014752088, %v1432_v25  ;;  %v1422_v29 = vadd.f32 0.0036580483, %v1421_v24  ;;  %v2307_v25 = vld [vmem:[%s3187_s6 + $0x1] ss:$0 sm:$0xff] }
 0x93a   : > { %v1434_v30 = vmul.f32 %v1433_v27, %v1418_v16  ;;  %v1423_v35 = vmul.f32 %v1422_v29, %v1418_v16 }
 0x93c   : > { %v1435_v33 = vadd.f32 0.112945676, %v1434_v30  ;;  %v1424_v32 = vadd.f32 0.05243302, %v1423_v35 }
 0x93e   : > { %v1436_v37 = vmul.f32 %v1435_v33, %v1418_v16  ;;  %v1425_v42 = vmul.f32 %v1424_v32, %v1418_v16 }
 0x940   : > { %v1437_v38 = vadd.f32 0.4994258, %v1436_v37  ;;  %v1426_v43 = vadd.f32 0.18741608, %v1425_v42 }
 0x942   : > { %v1438_v40 = vmul.f32 %v1437_v38, %v1418_v16  ;;  %v1427_v45 = vmul.f32 %v1426_v43, %v1418_v16 }
 0x944   : > { %v1439_v41 = vadd.f32 1.0, %v1438_v40  ;;  %v1428_v50 = vadd.f32 1.1283791, %v1427_v45 }
 0x946   : > { %2339 = vrcp.f32 %v1439_v41  ;;  %v1451_v49 = vand.u32 2147483648, %v1439_v41  ;;  %v1449_v52 = vand.u32 2147483647, %v1439_v41  ;;  %vm1445_vm15 = vweird.f32 %v1439_v41 }
 0x947   : > { %v1429_v55 = vmul.f32 %v1428_v50, %v1416_v14 }
 0x948   : > { %v1452_v54 = vor.u32 1.1754944e-38, %v1451_v49  ;;  %vm1450_vm1 = vcmp.eq.f32.partialorder %v1449_v52, 8.507059e+37 }
 0x94c   : > { %v2340_v44 = vpop.eup %2339 }
 0x94d   : > { %v1441_v46 = vmul.f32 %v2340_v44, %v1439_v41  ;;  %vm1446_vm14 = vweird.f32 %v2340_v44  ;;  %v2231_v41 = vld [vmem:[%s3190_s9 + $0x20] sm:$0xff] }
 0x94e   : > { %vm1447_vm0 = vmor %vm1445_vm15, %vm1446_vm14  ;;  %1740 = vmatpush.msrb.mxu2 %v2231_v41  ;;  %v2309_v41 = vld [vmem:[%s3191_s10 + $0x1] ss:$0 sm:$0xff] }
 0x94f   : > { %v1442_v47 = vsub.f32 1.0, %v1441_v46 }
 0x951   : > { %v1443_v51 = vmul.f32 %v2340_v44, %v1442_v47 }
 0x953   : > { %v1444_v53 = vadd.f32 %v2340_v44, %v1443_v51 }
 0x955   : > { %v1448_v60 = vsel %vm1447_vm0, %v2340_v44, %v1444_v53 }
 0x956   : > { %v1453_v56 = vsel %vm1450_vm1, %v1452_v54, %v1448_v60 }
 0x957   : > { %v1454_v57 = vmul.f32 %v1453_v56, %v1429_v55 }
 0x959   : > { %v2221_v58 = vclamps-f32 %v1454_v57, 1.0 }
 0x95b   : > { %v1457_v61 = vadd.f32 1.0, %v2221_v58 }
 0x95d   : > { %v1458_v62 = vmul.f32 %v1457_v61, %v1415_v59 }
 0x95f   : > { %2222 = vmatmul.msk.f32.vlgmr.msra.gmra.mxu2 %vm1471_vm2, %v1458_v62 }
 0x9e2   : > { %v1492_v0 = vpop.f32.mrf.mxu2 }
 0x9e3   : > { %v1493_v1 = vadd.f32 %v2305_v63, %v1492_v0 }
 0x9e5   : > { %v2989_v2 = vadd.f32 %v1493_v1, %v2930_v48  ;;  %v2227_v48 = vld [vmem:[%s3188_s7 + $0x30] sm:$0xff] }
 0x9e6   : > { %1556 = vmatpush.msra.mxu3 %v2227_v48 }
 0x9e7   : > { %v1500_v3 = vsel %vm916_vm3, %v2989_v2, 0.0 }
 0x9e8   : > { %1501 = vadd.xlane.f32.xlu0 %v1500_v3  ;;  %1557 = vmatpush.msra.mxu3 %v2226_v11 }
 0x9ea   : > { %1558 = vmatpush.msra.mxu3 %v2225_v12 }
 0xa5b   : > { %v1502_v5 = vpop.xlane.xlu0 %1501 }
 0xa5c   : > { %v1503_v6 = vmul.f32 %v1502_v5, %v2830_v4 }
 0xa5e   : > { %v1504_v7 = vsub.f32 %v2989_v2, %v1503_v6 }
 0xa60   : > { %v1505_v8 = vmul.f32 %v1504_v7, %v1504_v7 }
 0xa62   : > { %v1506_v9 = vsel %vm916_vm3, %v1505_v8, 0.0 }
 0xa63   : > { %1507 = vadd.xlane.f32.xlu1 %v1506_v9 }
 0xad6   : > { %v1508_v13 = vpop.xlane.xlu1 %1507 }
 0xad7   : > { %v1509_v14 = vmul.f32 %v1508_v13, %v2830_v4 }
 0xad9   : > { %v1510_v15 = vadd.f32 1e-12, %v1509_v14 }
 0xadb   : > { %2341 = vrsqrt.f32 %v1510_v15  ;;  %vm1517_vm5 = vweird.f32 %v1510_v15 }
 0xae1   : > { %v2342_v16 = vpop.eup %2341 }
 0xae2   : > { %v1512_v17 = vmul.f32 %v2342_v16, %v1510_v15  ;;  %vm1518_vm4 = vweird.f32 %v2342_v16 }
 0xae3   : > { %vm1519_vm6 = vmor %vm1517_vm5, %vm1518_vm4 }
 0xae4   : > { %v1513_v18 = vmul.f32 %v2342_v16, %v1512_v17 }
 0xae6   : > { %v1514_v19 = vmul.f32 0.5, %v1513_v18 }
 0xae8   : > { %v1515_v20 = vsub.f32 1.5, %v1514_v19 }
 0xaea   : > { %v1516_v21 = vmul.f32 %v2342_v16, %v1515_v20 }
 0xaec   : > { %v1520_v23 = vsel %vm1519_vm6, %v2342_v16, %v1516_v21 }
 0xaed   : > { %v1521_v24 = vmul.f32 %v1520_v23, %v1504_v7 }
 0xaef   : > { %v1525_v26 = vmul.f32 %v2306_v22, %v1521_v24 }
 0xaf1   : > { %v1529_v27 = vadd.f32 %v2307_v25, %v1525_v26 }
 0xaf3   : > { %2230 = vmatmul.msk.f32.vlgmr.msra.gmra.mxu3 %vm916_vm3, %v1529_v27 }
 0xb76   : > { %v1560_v29 = vpop.f32.mrf.mxu3 }
 0xb77   : > { %v1561_v30 = vadd.f32 %v2308_v28, %v1560_v29  ;;  %v2234_v28 = vld [vmem:[%s3190_s9 + $0x38] sm:$0xff]  ;;  %v2232_v29 = vld [vmem:[%s3190_s9 + $0x28] sm:$0xff] }
 0xb79   : > { %1563 = vst.msk [vmem:[#allocation3] sm:$0xff] %vm985_vm8, %v1561_v30  ;;  %v2233_v30 = vld [vmem:[%s3190_s9 + $0x30] sm:$0xff] }
 0xb80   : > { %v3020_v31 = vld [vmem:[#allocation3] sm:$0xff] }
 0xb81   : > { %1636 = vrot.lane.b32.xlu0 %v3020_v31, %s2377_s4  ;;  %1571 = vrot.lane.b32.xlu2 %v3020_v31, %s2376_s0  ;;  %s3229_s4 = smov 64   ;;  %s3230_s0 = smov 120  }
 0xb89   : > { %1745 = vrot.lane.b32.xlu0 %v3020_v31, %s2384_s23  ;;  %s3231_s23 = smov 72  }
 0xbdb   : > { %v1572_v33 = vpop.permute.xlu2 %1571 }
 0xbdc   : > { %2235 = vmatpush.xpose.msk.msra.mxu0 %vm995_vm9, %v1572_v33 }
 0xbdf   : > { %2236 = vmatmul.msk.f32.vlgmr.msra.gmra.mxu0 %vm995_vm9, %v3020_v31 }
 0xbf3   : > { %v1637_v34 = vpop.permute.xlu0 %1636 }
 0xbf4   : > { %2238 = vmatpush.xpose.msk.msrb.mxu3 %vm995_vm9, %v1637_v34 }
 0xbfb   : > { %v1746_v49 = vpop.permute.xlu0 %1745 }
 0xc5c   : > { %v1594_v35 = vpop.f32.mrf.mxu0 }
 0xc5d   : > { %v1595_v36 = vadd.f32 %v1594_v35, %v2872_v39 }
 0xc5f   : > { %v1597_v37 = vsel %vm995_vm9, %v1595_v36, -inf }
 0xc60   : > { %1598 = vmax.xlane.f32.xlu1 %v1597_v37 }
 0xc79   : > { %1608 = vrot.lane.b32.xlu1 %v3020_v31, %s3229_s4 }
 0xc81   : > { %1634 = vrot.lane.b32.xlu1 %v3020_v31, %s3230_s0 }
 0xc89   : > { %1836 = vrot.lane.b32.xlu1 %v3020_v31, %s3231_s23 }
 0xc91   : > { %1747 = vrot.lane.b32.xlu1 %v3020_v31, %s3232_s28 }
 0xcd3   : > { %v1599_v38 = vpop.xlane.xlu1 %1598 }
 0xcd4   : > { %v1600_v32 = vsub.f32 %v1595_v36, %v1599_v38 }
 0xcd6   : > { %v1601_v40 = vmul.f32 1.442695, %v1600_v32 }
 0xcd8   : > { %2343 = vpow2.f32 %v1601_v40 }
 0xcde   : > { %v2344_v42 = vpop.eup %2343 }
 0xcdf   : > { %v1603_v43 = vsel %vm995_vm9, %v2344_v42, 0.0 }
 0xce0   : > { %1604 = vadd.xlane.f32.xlu2 %v1603_v43 }
 0xceb   : > { %v1609_v44 = vpop.permute.xlu1 %1608 }
 0xcec   : > { %1629 = vmatpush.msra.mxu1 %v1609_v44 }
 0xcee   : > { %1717 = vmatpush.msrb.mxu1 %v2232_v29  ;;  %v2261_v29 = vld [vmem:[%s3196_s15 + $0x40] sm:$0xff] }
 0xcf3   : > { %v1635_v45 = vpop.permute.xlu1 %1634 }
 0xcf4   : > { %2239 = vmatmul.msk.f32.vlgmr.msrb.gmra.mxu3 %vm995_vm9, %v1635_v45 }
 0xcf8   : > { %1834 = vrot.lane.b32.xlu2 %v3020_v31, %s3233_s1 }
 0xcfb   : > { %v1837_v46 = vpop.permute.xlu1 %1836 }
 0xcfc   : > { %2247 = vmatpush.xpose.msk.msra.mxu2 %vm995_vm9, %v1837_v46 }
 0xd03   : > { %v1748_v47 = vpop.permute.xlu1 %1747 }
 0xd04   : > { %2243 = vmatpush.xpose.msk.msra.mxu3 %vm995_vm9, %v1748_v47 }
 0xd07   : > { %2244 = vmatmul.msk.f32.vlgmr.msra.gmra.mxu3 %vm995_vm9, %v1746_v49 }
 0xd53   : > { %v1605_v50 = vpop.xlane.xlu2 %1604 }
 0xd54   : > { %2345 = vrcp.f32 %v1605_v50 }
 0xd5a   : > { %v2346_v51 = vpop.eup %2345 }
 0xd5b   : > { %v1607_v52 = vmul.f32 %v2346_v51, %v2344_v42  ;;  %v1835_v59 = vpop.permute.xlu2 %1834  ;;  %v2257_v51 = vld [vmem:[%s3194_s13 + $0x38] sm:$0xff] }
 0xd5d   : > { %2237 = vmatmul.msk.f32.vlgmr.msra.gmra.mxu1 %vm995_vm9, %v1607_v52  ;;  %v2255_v52 = vld [vmem:[%s3194_s13 + $0x28] sm:$0xff] }
 0xd5e   : > { %1828 = vmatpush.msra.mxu1 %v2233_v30 }
 0xd77   : > { %v1659_v53 = vpop.f32.mrf.mxu3 }
 0xd78   : > { %v1660_v54 = vadd.f32 %v1659_v53, %v2872_v39  ;;  %v2254_v53 = vld [vmem:[%s3194_s13 + $0x20] sm:$0xff] }
 0xd7a   : > { %v1662_v55 = vsel %vm995_vm9, %v1660_v54, -inf }
 0xd7b   : > { %1663 = vmax.xlane.f32.xlu1 %v1662_v55 }
 0xd8a   : > { %v1770_v60 = vpop.f32.mrf.mxu3 }
 0xd8b   : > { %v1771_v56 = vadd.f32 %v1770_v60, %v2872_v39 }
 0xd8d   : > { %v1773_v57 = vsel %vm995_vm9, %v1771_v56, -inf }
 0xd8e   : > { %1774 = vmax.xlane.f32.xlu2 %v1773_v57 }
 0xda6   : > { %1873 = vrot.lane.b32.xlu2 %v3020_v31, %s3234_s26  ;;  %s2202_s26 = sshll.u32 %s3239_s25, 3 }
 0xda7   : > { %s654_s0 = scalar_lea.vmem %s3202_s21, %s2202_s26 }
 0xdda   : > { %v1631_v58 = vpop.f32.mrf.mxu1 }
 0xddb   : > { %2242 = vmatmul.msk.f32.vlgmr.msrb.gmra.mxu2 %vm995_vm9, %v1631_v58 }
 0xde3   : > { %2248 = vmatmul.msk.f32.vlgmr.msra.gmra.mxu2 %vm995_vm9, %v1835_v59 }
 0xdee   : > { %v1664_v61 = vpop.xlane.xlu1 %1663 }
 0xdef   : > { %v1665_v62 = vsub.f32 %v1660_v54, %v1664_v61 }
 0xdf1   : > { %v1666_v63 = vmul.f32 1.442695, %v1665_v62 }
 0xdf3   : > { %2347 = vpow2.f32 %v1666_v63  ;;  %v2310_v63 = vld [vmem:[%s3192_s11 + $0x1] ss:$0 sm:$0xff] }
 0xdf9   : > { %v2348_v0 = vpop.eup %2347 }
 0xdfa   : > { %v1668_v1 = vsel %vm995_vm9, %v2348_v0, 0.0 }
 0xdfb   : > { %1669 = vadd.xlane.f32.xlu1 %v1668_v1 }
 0xe01   : > { %v1775_v3 = vpop.xlane.xlu2 %1774 }
 0xe02   : > { %v1776_v5 = vsub.f32 %v1771_v56, %v1775_v3  ;;  %v2311_v3 = vld [vmem:[%s3193_s12 + $0x1] ss:$0 sm:$0xff] }
 0xe04   : > { %v1777_v6 = vmul.f32 1.442695, %v1776_v5 }
 0xe06   : > { %2349 = vpow2.f32 %v1777_v6 }
 0xe09   : > { %v1874_v7 = vpop.permute.xlu2 %1873 }
 0xe0a   : > { %1894 = vmatpush.msrb.mxu3 %v1874_v7  ;;  %v2312_v7 = vld [vmem:[%s3195_s14 + $0x1] ss:$0 sm:$0xff] }
 0xe0c   : > { %v2350_v8 = vpop.eup %2349 }
 0xe0d   : > { %v1779_v9 = vsel %vm995_vm9, %v2350_v8, 0.0 }
 0xe0e   : > { %1780 = vadd.xlane.f32.xlu1 %v1779_v9 }
 0xe27   : > { %1784 = vrot.lane.b32.xlu1 %v3020_v31, %s3235_s22 }
 0xe5e   : > { %v1742_v10 = vpop.f32.mrf.mxu2 }
 0xe66   : > { %v1859_v48 = vpop.f32.mrf.mxu2 }
 0xe67   : > { %v1860_v11 = vadd.f32 %v1859_v48, %v2872_v39 }
 0xe69   : > { %v1862_v12 = vsel %vm995_vm9, %v1860_v11, -inf }
 0xe6a   : > { %1863 = vmax.xlane.f32.xlu0 %v1862_v12  ;;  %v2268_v12 = vld [vmem:[%s3196_s15 + $0x78] sm:$0xff] }
 0xe6b   : > { %2066 = vmatpush.msrb.mxu2 %v2268_v12 }
 0xe6e   : > { %v1670_v19 = vpop.xlane.xlu1 %1669 }
 0xe81   : > { %v1781_v39 = vpop.xlane.xlu1 %1780 }
 0xe99   : > { %v1785_v25 = vpop.permute.xlu1 %1784 }
 0xedd   : > { %v1864_v13 = vpop.xlane.xlu0 %1863 }
 0xede   : > { %v1865_v14 = vsub.f32 %v1860_v11, %v1864_v13 }
 0xee0   : > { %v1866_v15 = vmul.f32 1.442695, %v1865_v14 }
 0xee2   : > { %2351 = vpow2.f32 %v1866_v15  ;;  %v2267_v15 = vld [vmem:[%s3196_s15 + $0x70] sm:$0xff] }
 0xee3   : > { %2067 = vmatpush.msrb.mxu2 %v2267_v15 }
 0xee8   : > { %v2352_v16 = vpop.eup %2351 }
 0xee9   : > { %v1868_v17 = vsel %vm995_vm9, %v2352_v16, 0.0 }
 0xeea   : > { %1869 = vadd.xlane.f32.xlu0 %v1868_v17 }
 0xefe   : > { %1673 = vrot.lane.b32.xlu0 %v3020_v31, %s3236_s27 }
 0xf5d   : > { %v1870_v18 = vpop.xlane.xlu0 %1869 }
 0xf5e   : > { %2353 = vrcp.f32 %v1870_v18  ;;  %v2266_v18 = vld [vmem:[%s3196_s15 + $0x68] sm:$0xff] }
 0xf5f   : > { %2355 = vrcp.f32 %v1670_v19  ;;  %2068 = vmatpush.msrb.mxu2 %v2266_v18 }
 0xf60   : > { %2357 = vrcp.f32 %v1781_v39 }
 0xf64   : > { %v2354_v20 = vpop.eup %2353 }
 0xf65   : > { %v1872_v21 = vmul.f32 %v2354_v20, %v2352_v16  ;;  %v2356_v22 = vpop.eup %2355 }
 0xf66   : > { %v1672_v23 = vmul.f32 %v2356_v22, %v2348_v0  ;;  %v2358_v26 = vpop.eup %2357  ;;  %v2264_v22 = vld [vmem:[%s3196_s15 + $0x58] sm:$0xff] }
 0xf67   : > { %2249 = vmatmul.msk.f32.vlgmr.msrb.gmra.mxu3 %vm995_vm9, %v1872_v21  ;;  %v1783_v27 = vmul.f32 %v2358_v26, %v2350_v8  ;;  %v2265_v21 = vld [vmem:[%s3196_s15 + $0x60] sm:$0xff] }
 0xf68   : > { %2069 = vmatpush.msrb.mxu2 %v2265_v21  ;;  %v2316_v21 = vld [vmem:[%s3201_s20] ss:$0 sm:$0xff] }
 0xf6a   : > { %2070 = vmatpush.msrb.mxu2 %v2264_v22 }
 0xf70   : > { %v1674_v24 = vpop.permute.xlu0 %1673 }
 0xf71   : > { %1694 = vmatpush.msrb.mxu0 %v1674_v24 }
 0xf72   : > { %2240 = vmatmul.msk.f32.vlgmr.msrb.gmra.mxu0 %vm995_vm9, %v1672_v23 }
 0xf73   : > { %1805 = vmatpush.msra.mxu0 %v1785_v25  ;;  %v2263_v25 = vld [vmem:[%s3196_s15 + $0x50] sm:$0xff] }
 0xf74   : > { %2071 = vmatpush.msrb.mxu2 %v2263_v25 }
 0xf75   : > { %1917 = vmatpush.msrb.mxu0 %v2234_v28 }
 0xf7a   : > { %2245 = vmatmul.msk.f32.vlgmr.msra.gmra.mxu0 %vm995_vm9, %v1783_v27  ;;  %v2262_v27 = vld [vmem:[%s3196_s15 + $0x48] sm:$0xff] }
 0xf7b   : > { %2072 = vmatpush.msrb.mxu2 %v2262_v27 }
 0xf7d   : > { %2073 = vmatpush.msrb.mxu2 %v2261_v29 }
 0xfea   : > { %v1896_v31 = vpop.f32.mrf.mxu3 }
 0xfeb   : > { %2250 = vmatmul.msk.f32.vlgmr.msrb.gmra.mxu0 %vm995_vm9, %v1896_v31 }
 0xfef   : > { %v1696_v33 = vpop.f32.mrf.mxu0 }
 0xff0   : > { %2241 = vmatmul.msk.f32.vlgmr.msrb.gmra.mxu1 %vm995_vm9, %v1696_v33 }
 0xff1   : > { %1989 = vmatpush.msrb.mxu1 %v2257_v51 }
 0xff7   : > { %v1807_v34 = vpop.f32.mrf.mxu0 }
 0xff8   : > { %2246 = vmatmul.msk.f32.vlgmr.msra.gmra.mxu1 %vm995_vm9, %v1807_v34 }
0x1068   : > { %v1919_v32 = vpop.f32.mrf.mxu0 }
0x106d   : > { %v1719_v35 = vpop.f32.mrf.mxu1 }
0x106e   : > { %v1743_v36 = vadd.f32 %v1742_v10, %v1719_v35 }
0x1075   : > { %v1830_v37 = vpop.f32.mrf.mxu1 }
0x1076   : > { %v1833_v38 = vadd.f32 %v1830_v37, %v1743_v36 }
0x1078   : > { %v1922_v40 = vadd.f32 %v1919_v32, %v1833_v38 }
0x107a   : > { %v1923_v42 = vadd.f32 %v1922_v40, %v2989_v2  ;;  %v2256_v2 = vld [vmem:[%s3194_s13 + $0x30] sm:$0xff] }
0x107b   : > { %1990 = vmatpush.msrb.mxu1 %v2256_v2 }
0x107c   : > { %v3089_v43 = vadd.f32 %v2309_v41, %v1923_v42 }
0x107d   : > { %1991 = vmatpush.msrb.mxu1 %v2255_v52 }
0x107e   : > { %v1934_v44 = vsel %vm916_vm3, %v3089_v43, 0.0 }
0x107f   : > { %1935 = vadd.xlane.f32.xlu0 %v1934_v44  ;;  %1992 = vmatpush.msrb.mxu1 %v2254_v53 }
0x10f2   : > { %v1936_v45 = vpop.xlane.xlu0 %1935 }
0x10f3   : > { %v1937_v46 = vmul.f32 %v1936_v45, %v2830_v4 }
0x10f5   : > { %v1938_v47 = vsub.f32 %v3089_v43, %v1937_v46 }
0x10f7   : > { %v1939_v49 = vmul.f32 %v1938_v47, %v1938_v47 }
0x10f9   : > { %v1940_v50 = vsel %vm916_vm3, %v1939_v49, 0.0 }
0x10fa   : > { %1941 = vadd.xlane.f32.xlu2 %v1940_v50 }
0x116d   : > { %v1942_v54 = vpop.xlane.xlu2 %1941 }
0x116e   : > { %v1943_v55 = vmul.f32 %v1942_v54, %v2830_v4 }
0x1170   : > { %v1944_v60 = vadd.f32 1e-12, %v1943_v55 }
0x1172   : > { %2359 = vrsqrt.f32 %v1944_v60  ;;  %vm1951_vm8 = vweird.f32 %v1944_v60 }
0x1178   : > { %v2360_v56 = vpop.eup %2359 }
0x1179   : > { %v1946_v57 = vmul.f32 %v2360_v56, %v1944_v60  ;;  %vm1952_vm7 = vweird.f32 %v2360_v56 }
0x117a   : > { %vm1953_vm9 = vmor %vm1951_vm8, %vm1952_vm7 }
0x117b   : > { %v1947_v58 = vmul.f32 %v2360_v56, %v1946_v57 }
0x117d   : > { %v1948_v59 = vmul.f32 0.5, %v1947_v58 }
0x117f   : > { %v1949_v61 = vsub.f32 1.5, %v1948_v59 }
0x1181   : > { %v1950_v62 = vmul.f32 %v2360_v56, %v1949_v61 }
0x1183   : > { %v1954_v0 = vsel %vm1953_vm9, %v2360_v56, %v1950_v62  ;;  %v2313_v56 = vld [vmem:[%s3197_s16 + $0x1] ss:$0 sm:$0xff] }
0x1184   : > { %v1955_v1 = vmul.f32 %v1954_v0, %v1938_v47 }
0x1186   : > { %v1959_v5 = vmul.f32 %v2310_v63, %v1955_v1 }
0x1188   : > { %v1963_v6 = vadd.f32 %v2311_v3, %v1959_v5  ;;  %v2114_v5 = vld [vmem:[%s3200_s19 + $0x18] sm:$0xff] }
0x1189   : > { %2134 = vmatpush.msra.mxu3 %v2114_v5 }
0x118a   : > { %2259 = vmatmul.msk.f32.vlgmr.msrb.gmra.mxu1 %vm916_vm3, %v1963_v6  ;;  %v2112_v6 = vld [vmem:[%s3200_s19 + $0x8] sm:$0xff] }
0x1207   : > { %v1994_v8 = vpop.f32.mrf.mxu1 }
0x1208   : > { %v1995_v9 = vadd.f32 %v2312_v7, %v1994_v8  ;;  %v2111_v7 = vld [vmem:[%s3200_s19] sm:$0xff] }
0x120a   : > { %v1998_v10 = vmul.f32 0.70710677, %v1995_v9  ;;  %v1997_v54 = vmul.f32 0.5, %v1995_v9 }
0x120c   : > { %v1999_v48 = vmul.f32 %v1998_v10, %v1998_v10 }
0x120e   : > { %v2000_v11 = vmin.f32 %v1999_v48, 16.0 }
0x1210   : > { %v2001_v13 = vmul.f32 2.1237322e-06, %v2000_v11  ;;  %v2012_v14 = vmul.f32 3.8918573e-05, %v2000_v11 }
0x1212   : > { %v2002_v16 = vadd.f32 0.00028619796, %v2001_v13  ;;  %v2013_v17 = vadd.f32 0.001143296, %v2012_v14 }
0x1214   : > { %v2003_v19 = vmul.f32 %v2002_v16, %v2000_v11  ;;  %v2014_v20 = vmul.f32 %v2013_v17, %v2000_v11  ;;  %v2314_v16 = vld [vmem:[%s3198_s17] ss:$0 sm:$0xff] }
0x1216   : > { %v2015_v39 = vadd.f32 0.014752088, %v2014_v20  ;;  %v2004_v23 = vadd.f32 0.0036580483, %v2003_v19 }
0x1218   : > { %v2016_v24 = vmul.f32 %v2015_v39, %v2000_v11  ;;  %v2005_v28 = vmul.f32 %v2004_v23, %v2000_v11 }
0x121a   : > { %v2017_v26 = vadd.f32 0.112945676, %v2016_v24  ;;  %v2006_v33 = vadd.f32 0.05243302, %v2005_v28 }
0x121c   : > { %v2018_v30 = vmul.f32 %v2017_v26, %v2000_v11  ;;  %v2007_v36 = vmul.f32 %v2006_v33, %v2000_v11 }
0x121e   : > { %v2019_v31 = vadd.f32 0.4994258, %v2018_v30  ;;  %v2008_v37 = vadd.f32 0.18741608, %v2007_v36 }
0x1220   : > { %v2020_v34 = vmul.f32 %v2019_v31, %v2000_v11  ;;  %v2009_v32 = vmul.f32 %v2008_v37, %v2000_v11 }
0x1222   : > { %v2021_v35 = vadd.f32 1.0, %v2020_v34  ;;  %v2010_v44 = vadd.f32 1.1283791, %v2009_v32 }
0x1224   : > { %2361 = vrcp.f32 %v2021_v35  ;;  %v2033_v42 = vand.u32 2147483648, %v2021_v35  ;;  %v2031_v46 = vand.u32 2147483647, %v2021_v35  ;;  %vm2027_vm11 = vweird.f32 %v2021_v35 }
0x1225   : > { %v2011_v50 = vmul.f32 %v2010_v44, %v1998_v10 }
0x1226   : > { %v2034_v49 = vor.u32 1.1754944e-38, %v2033_v42  ;;  %vm2032_vm13 = vcmp.eq.f32.partialorder %v2031_v46, 8.507059e+37 }
0x122a   : > { %v2362_v38 = vpop.eup %2361 }
0x122b   : > { %v2023_v40 = vmul.f32 %v2362_v38, %v2021_v35  ;;  %vm2028_vm10 = vweird.f32 %v2362_v38 }
0x122c   : > { %vm2029_vm12 = vmor %vm2027_vm11, %vm2028_vm10 }
0x122d   : > { %v2024_v41 = vsub.f32 1.0, %v2023_v40 }
0x122f   : > { %v2025_v45 = vmul.f32 %v2362_v38, %v2024_v41 }
0x1231   : > { %v2026_v47 = vadd.f32 %v2362_v38, %v2025_v45 }
0x1233   : > { %v2030_v51 = vsel %vm2029_vm12, %v2362_v38, %v2026_v47 }
0x1234   : > { %v2035_v2 = vsel %vm2032_vm13, %v2034_v49, %v2030_v51 }
0x1235   : > { %v2036_v52 = vmul.f32 %v2035_v2, %v2011_v50 }
0x1237   : > { %v2260_v53 = vclamps-f32 %v2036_v52, 1.0 }
0x1239   : > { %v2039_v55 = vadd.f32 1.0, %v2260_v53 }
0x123b   : > { %v2040_v60 = vmul.f32 %v2039_v55, %v1997_v54 }
0x123d   : > { %2270 = vmatmul.msk.f32.vlgmr.msrb.gmra.mxu2 %vm1471_vm2, %v2040_v60 }
0x12c0   : > { %v2075_v57 = vpop.f32.mrf.mxu2 }
0x12c1   : > { %v2076_v58 = vadd.f32 %v2313_v56, %v2075_v57 }
0x12c3   : > { %v2078_v59 = vadd.f32 %v2076_v58, %v3089_v43  ;;  %v2113_v43 = vld [vmem:[%s3200_s19 + $0x10] sm:$0xff] }
0x12c4   : > { %2135 = vmatpush.msra.mxu3 %v2113_v43 }
0x12c5   : > { %v2081_v61 = vsel %vm916_vm3, %v2078_v59, 0.0 }
0x12c6   : > { %2082 = vadd.xlane.f32.xlu1 %v2081_v61  ;;  %2136 = vmatpush.msra.mxu3 %v2112_v6 }
0x12c8   : > { %2137 = vmatpush.msra.mxu3 %v2111_v7 }
0x1339   : > { %v2083_v62 = vpop.xlane.xlu1 %2082 }
0x133a   : > { %v2084_v63 = vmul.f32 %v2083_v62, %v2830_v4 }
0x133c   : > { %v2085_v0 = vsub.f32 %v2078_v59, %v2084_v63 }
0x133e   : > { %v2086_v1 = vmul.f32 %v2085_v0, %v2085_v0 }
0x1340   : > { %v2087_v3 = vsel %vm916_vm3, %v2086_v1, 0.0 }
0x1341   : > { %2088 = vadd.xlane.f32.xlu0 %v2087_v3 }
0x13b4   : > { %v2089_v8 = vpop.xlane.xlu0 %2088 }
0x13b5   : > { %v2090_v9 = vmul.f32 %v2089_v8, %v2830_v4  ;;  %v2315_v4 = vld [vmem:[%s3199_s18] ss:$0 sm:$0xff] }
0x13b7   : > { %v2091_v10 = vadd.f32 1e-12, %v2090_v9 }
0x13b9   : > { %2363 = vrsqrt.f32 %v2091_v10  ;;  %vm2098_vm15 = vweird.f32 %v2091_v10 }
0x13bf   : > { %v2364_v48 = vpop.eup %2363 }
0x13c0   : > { %v2093_v11 = vmul.f32 %v2364_v48, %v2091_v10  ;;  %vm2099_vm14 = vweird.f32 %v2364_v48 }
0x13c1   : > { %vm2100_vm0 = vmor %vm2098_vm15, %vm2099_vm14 }
0x13c2   : > { %v2094_v12 = vmul.f32 %v2364_v48, %v2093_v11 }
0x13c4   : > { %v2095_v13 = vmul.f32 0.5, %v2094_v12 }
0x13c6   : > { %v2096_v14 = vsub.f32 1.5, %v2095_v13 }
0x13c8   : > { %v2097_v15 = vmul.f32 %v2364_v48, %v2096_v14 }
0x13ca   : > { %v2101_v17 = vsel %vm2100_vm0, %v2364_v48, %v2097_v15 }
0x13cb   : > { %v2102_v18 = vmul.f32 %v2101_v17, %v2085_v0 }
0x13cd   : > { %v2106_v19 = vmul.f32 %v2314_v16, %v2102_v18 }
0x13cf   : > { %v2110_v20 = vadd.f32 %v2315_v4, %v2106_v19 }
0x13d1   : > { %2271 = vmatmul.msk.f32.vlgmr.msra.gmra.mxu3 %vm916_vm3, %v2110_v20 }
0x1454   : > { %v2139_v39 = vpop.f32.mrf.mxu3 }
0x1455   : > { %v2140_v22 = vadd.f32 %v2316_v21, %v2139_v39 }
0x1457   : > { %2142 = vst [vmem:[%s654_s0] sm:$0xff] %v2140_v22 }
0x1458 PF: > { %s3237_s23 = sld [smem:[#allocation4_spill]] }
0x145e   : > { %s31_s2 = sadd.s32 1, %s3237_s23  }
0x145f   : > { %p28_p4 = scmp.ge.s32.totalorder %s31_s2, 4  }
0x1461   :  { %30 = sbr.rel (!%p28_p4) target bundleno = 7 (0x7), region = 148 }

</bundles_post_ra>
